<compile_context>
chip_gen: v5e
topology: v5e:2x2
jax: 0.10.0
libtpu: 0.0.40
codegen_flags: <defaults>
</compile_context>

<pallas_src>
import numpy as np
import jax
import jax.numpy as jnp
from jax import lax
from jax.experimental import pallas as pl
from jax.experimental.pallas import tpu as pltpu

NEG_SLOPE = 0.2      # GATConv default negative_slope
NEG_INF = -1e30      # additive non-edge bias (safe: every row has a self loop)


# ----------------------------------------------------------------------------
# Fused kernel: GAT layers -> FC head -> per-sample power scaling + threshold.
# One grid step processes TB samples; projections fold the batch into M rows,
# attention runs per sample on (N_pad, N_pad) tiles.
# ----------------------------------------------------------------------------
def _make_fused_kernel(heads_per_layer, num_fc, threshold, n_pad, n_sec, tb):
    n_gat = len(heads_per_layer)

    def kernel(*refs):
        i = 0
        pt_ref = refs[i]; i += 1              # (1,) f32, SMEM
        x_ref = refs[i]; i += 1               # (1, M, F_in) bf16, M = tb*n_pad
        mask_ref = refs[i]; i += 1            # (n_pad, n_pad) f32 additive bias
        gat_refs = refs[i:i + 5 * n_gat]; i += 5 * n_gat
        fc_refs = refs[i:i + 2 * num_fc]; i += 2 * num_fc
        pp_ref = refs[i]; i += 1              # (1, tb, N_prim) f32
        out_ref = refs[i]                     # (1, tb, n_sec, fout) f32

        mask_bias = mask_ref[...]             # 0 on edges / -1e30 on non-edges
        x = x_ref[0]                          # (M, F_in)

        # ----------------------------- GAT layers ---------------------------
        for l, heads in enumerate(heads_per_layer):
            w_ref, att_dst_ref, att_src_ref, hmask_ref, bias_ref = \
                gat_refs[5 * l:5 * l + 5]
            # projection with batch folded into M; bf16 inputs, f32 accumulation
            xp = jnp.dot(x.astype(jnp.bfloat16), w_ref[...],
                         preferred_element_type=jnp.float32)          # (M, HC)
            # destination / source scores for ALL heads with two matmuls
            a_dst_all = jnp.dot(xp, att_dst_ref[...],
                                preferred_element_type=jnp.float32)   # (M, H)
            a_src_all = lax.dot_general(att_src_ref[...], xp,
                                        (((1,), (1,)), ((), ())),
                                        preferred_element_type=jnp.float32)  # (H, M)
            head_mask = hmask_ref[...]                                # (H, HC)
            xp_b = xp.astype(jnp.bfloat16)
            hc = xp.shape[1]

            outs = []
            for t in range(tb):                       # per-sample attention
                r0 = t * n_pad
                xp_t = xp_b[r0:r0 + n_pad, :]                          # (n_pad, HC)
                out_t = jnp.zeros((n_pad, hc), jnp.float32)
                for hd in range(heads):
                    a_dst = a_dst_all[r0:r0 + n_pad, hd:hd + 1]        # (n_pad, 1)
                    a_src = a_src_all[hd:hd + 1, r0:r0 + n_pad]        # (1, n_pad)
                    # analytic per-row bound: leaky monotone, masking only
                    # lowers the max -> all exponents <= 0, no (N,N) row-max.
                    bound = a_dst + jnp.max(a_src)
                    bound = jnp.where(bound > 0, bound, NEG_SLOPE * bound)
                    e = a_dst + a_src                                  # (n_pad, n_pad)
                    e = jnp.where(e > 0, e, NEG_SLOPE * e)             # leaky relu
                    # additive mask: non-edges underflow to exactly 0 after exp
                    ew = jnp.exp(e + mask_bias - bound)
                    rowsum = jnp.sum(ew, axis=1, keepdims=True)        # (n_pad, 1)
                    # flash-style: aggregate unnormalized, scale the small result
                    agg = jnp.dot(ew.astype(jnp.bfloat16), xp_t,
                                  preferred_element_type=jnp.float32)  # (n_pad, HC)
                    out_t = out_t + agg * (pl.reciprocal(rowsum, approx=True)
                                           * head_mask[hd:hd + 1, :])
                outs.append(out_t)
            out = outs[0] if tb == 1 else jnp.concatenate(outs, axis=0)  # (M, HC)
            x = jnp.maximum(out + bias_ref[...], 0.0)                    # relu

        # ---------------- FC head (Dropout == identity in eval) -------------
        # Applied to all rows to keep the 2-D (M, *) layout; dummy / primary
        # rows are discarded below (fc dims are tiny, extra rows are free).
        y = jnp.dot(x.astype(jnp.bfloat16), fc_refs[0][...],
                    preferred_element_type=jnp.float32) + fc_refs[1][...]
        for l in range(1, num_fc):
            y = jnp.maximum(y, 0.0)
            y = jnp.dot(y.astype(jnp.bfloat16), fc_refs[2 * l][...],
                        preferred_element_type=jnp.float32) + fc_refs[2 * l + 1][...]
        p = jnp.maximum(y, 0.0)                                        # (M, fout)

        # ------------- per-sample power-budget scaling + threshold ----------
        pp_all = pp_ref[0]                                             # (tb, N_prim)
        pt = pt_ref[0]
        for t in range(tb):
            p_sec = p[t * n_pad:t * n_pad + n_sec, :]                  # (n_sec, fout)
            seg = jnp.sum(p_sec)
            avail = jnp.maximum(pt - jnp.sum(pp_all[t:t + 1, :]), 0.0)
            ratio = jnp.minimum(avail / (seg + 1e-5), 1.0)             # exact divide
            scaled = p_sec * ratio
            # NOTE: (n_sec, fout) = (3, 4) -> masked store, negligible here.
            out_ref[0, t] = jnp.where(scaled > threshold, scaled, 0.0)

    return kernel


# ----------------------------------------------------------------------------
# Wrapper: builds operands / BlockSpecs and calls the fused kernel.
# ----------------------------------------------------------------------------
def gatnet_forward(packed, h, pP, pT, threshold, *, N, N_sec, TB):
    B, _, F_in = h.shape
    assert B % TB == 0
    G = B // TB                      # keep G >= 2 so megacore / pipelining engage
    N_pad = packed["N_pad"]
    M = TB * N_pad

    gat_ops = packed["gat"]
    fc_ops = packed["fc"]
    heads_per_layer = packed["heads"]
    mask_bias = packed["mask_bias"]
    num_fc = len(fc_ops)
    fout = fc_ops[-1][0].shape[1]
    N_prim = pP.shape[1]

    h_pad = jnp.pad(h, ((0, 0), (0, N_pad - N), (0, 0)))   # dummy nodes = zeros
    x = h_pad.astype(jnp.bfloat16).reshape(G, M, F_in)
    pp = pP.astype(jnp.float32).reshape(G, TB, N_prim)
    pt_arr = jnp.asarray([pT], dtype=jnp.float32)

    operands = [pt_arr, x, mask_bias]
    in_specs = [
        pl.BlockSpec(memory_space=pltpu.MemorySpace.SMEM),        # pT scalar
        pl.BlockSpec((1, M, F_in), lambda g: (g, 0, 0)),          # TB samples / step
        pl.BlockSpec(mask_bias.shape, lambda g: (0, 0)),          # (N_pad, N_pad)
    ]
    for ops in gat_ops:
        for a in ops:
            operands.append(a)
            in_specs.append(pl.BlockSpec(a.shape, lambda g: (0, 0)))
    for w, b in fc_ops:
        operands += [w, b]
        in_specs += [pl.BlockSpec(w.shape, lambda g: (0, 0)),
                     pl.BlockSpec(b.shape, lambda g: (0, 0))]
    operands.append(pp)
    in_specs.append(pl.BlockSpec((1, TB, N_prim), lambda g: (g, 0, 0)))

    # Advisory cost estimate so XLA does not treat the fused call as free.
    flops = 0
    trans = 0
    for (w, _att_dst, att_src_rows, _hm, _b) in gat_ops:
        in_d, hc = w.shape
        H = att_src_rows.shape[0]
        flops += 2 * M * in_d * hc                       # projection
        flops += 2 * M * hc * H * 2                      # dst + src scores
        flops += TB * H * (2 * N_pad * N_pad * hc + 8 * N_pad * N_pad)
        trans += TB * H * N_pad * N_pad                  # exp
    for (w, _b) in fc_ops:
        flops += 2 * M * w.shape[0] * w.shape[1]
    flops *= G
    trans *= G
    bytes_accessed = sum(int(a.size) * a.dtype.itemsize for a in operands)
    bytes_accessed += G * TB * N_sec * fout * 4

    kern = _make_fused_kernel(tuple(heads_per_layer), num_fc, threshold,
                              N_pad, N_sec, TB)
    out = pl.pallas_call(
        kern,
        out_shape=jax.ShapeDtypeStruct((G, TB, N_sec, fout), jnp.float32),
        grid=(G,),
        in_specs=in_specs,
        out_specs=pl.BlockSpec((1, TB, N_sec, fout), lambda g: (g, 0, 0, 0)),
        compiler_params=pltpu.CompilerParams(
            dimension_semantics=("parallel",),            # batch tiles independent
            vmem_limit_bytes=32 * 1024 * 1024),           # explicit VMEM budget
        cost_estimate=pl.CostEstimate(flops=int(flops),
                                      transcendentals=int(trans),
                                      bytes_accessed=int(bytes_accessed)),
    )(*operands)
    return out.reshape(B, N_sec, fout)


# ----------------------------------------------------------------------------
# Graph construction, parameter init, operand packing.
# ----------------------------------------------------------------------------
def build_adjacency(N_prim, N_sec):
    """Dense adjacency A[dst, src] incl. self loops (GATConv default)."""
    N = N_sec + 2 * N_prim
    A = np.eye(N, dtype=np.float32)
    for i in range(N_sec):
        for j in range(N_sec, N_sec + N_prim):
            A[j, i] = 1.0
            A[i, j] = 1.0
    for k in range(N_prim):
        i = N_sec + N_prim + k
        j = N_sec + k
        A[j, i] = 1.0
        A[i, j] = 1.0
    return jnp.asarray(A)


def init_params(key, N_antenna, out_features_seq, heads_seq, fc_seq):
    params = {"gat": [], "fc": []}
    in_ch = 2 * N_antenna
    for out_ch, heads in zip(out_features_seq, heads_seq):
        key, k1, k2, k3, k4 = jax.random.split(key, 5)
        w = jax.random.normal(k1, (in_ch, heads * out_ch), jnp.float32) / jnp.sqrt(in_ch)
        att_src = jax.random.normal(k2, (heads, out_ch), jnp.float32) * 0.1
        att_dst = jax.random.normal(k3, (heads, out_ch), jnp.float32) * 0.1
        bias = jax.random.normal(k4, (1, heads * out_ch), jnp.float32) * 0.01
        params["gat"].append((w, att_src, att_dst, bias, heads, out_ch))
        in_ch = heads * out_ch
    dims = [in_ch] + list(fc_seq)
    for a, b in zip(dims[:-1], dims[1:]):
        key, k1, k2 = jax.random.split(key, 3)
        w = jax.random.normal(k1, (a, b), jnp.float32) / jnp.sqrt(a)
        bb = jax.random.normal(k2, (1, b), jnp.float32) * 0.01
        params["fc"].append((w, bb))
    return params


def pack_params(params, adj, *, N, N_pad):
    """Kernel-friendly operands: block-structured attention matrices, bf16
    weights, and a padded per-sample ADDITIVE adjacency bias (0 / -1e30)."""
    gat_ops, heads_per_layer = [], []
    for (w, att_src, att_dst, bias, heads, out_ch) in params["gat"]:
        HC = heads * out_ch
        blk = np.kron(np.eye(heads, dtype=np.float32),
                      np.ones((out_ch, 1), dtype=np.float32))            # (HC, H)
        att_dst_mat = att_dst.reshape(HC, 1).astype(jnp.float32) * blk        # (HC, H)
        att_src_rows = att_src.reshape(1, HC).astype(jnp.float32) * blk.T     # (H, HC)
        head_mask = jnp.asarray(blk.T)                                         # (H, HC)
        gat_ops.append((w.astype(jnp.bfloat16), att_dst_mat, att_src_rows,
                        head_mask, bias.astype(jnp.float32)))
        heads_per_layer.append(heads)
    fc_ops = [(w.astype(jnp.bfloat16), b.astype(jnp.float32))
              for (w, b) in params["fc"]]

    adj_np = np.asarray(adj, dtype=np.float32)
    adj_pad = np.zeros((N_pad, N_pad), np.float32)
    adj_pad[:N, :N] = adj_np
    for d in range(N, N_pad):
        adj_pad[d, d] = 1.0     # isolated dummy nodes: self loop only
    # -1e30 masking + analytic bound requires every row to have >= 1 edge.
    assert np.all(adj_pad.sum(axis=1) > 0), "every node needs >=1 in-edge"
    mask_bias = jnp.asarray(
        np.where(adj_pad > 0, 0.0, NEG_INF).astype(np.float32))

    return {"gat": gat_ops, "fc": fc_ops, "heads": heads_per_layer,
            "mask_bias": mask_bias, "N_pad": N_pad}


# ----------------------------------------------------------------------------
# Pure-JAX reference mirroring the kernel's precision choices
# (bf16 MXU inputs, f32 accumulation / softmax) for a tight check.
# ----------------------------------------------------------------------------
def reference_forward(params, adj, h, pP, pT, threshold, N_sec):
    x = h.astype(jnp.float32)
    for (w, a_s, a_d, b, heads, out_ch) in params["gat"]:
        xp = jnp.einsum("bnf,fk->bnk", x.astype(jnp.bfloat16),
                        w.astype(jnp.bfloat16),
                        preferred_element_type=jnp.float32)
        outs = []
        for hd in range(heads):
            xh = xp[..., hd * out_ch:(hd + 1) * out_ch]
            asrc = jnp.sum(xh * a_s[hd], -1)
            adst = jnp.sum(xh * a_d[hd], -1)
            e = adst[:, :, None] + asrc[:, None, :]
            e = jnp.where(e > 0, e, NEG_SLOPE * e)
            e = jnp.where(adj[None] > 0, e, NEG_INF)
            e = e - jnp.max(e, axis=-1, keepdims=True)
            ew = jnp.exp(e)
            att = ew / jnp.sum(ew, axis=-1, keepdims=True)
            outs.append(jnp.einsum("bij,bjc->bic", att.astype(jnp.bfloat16),
                                   xh.astype(jnp.bfloat16),
                                   preferred_element_type=jnp.float32))
        x = jnp.maximum(jnp.concatenate(outs, -1) + b, 0.0)
    y = x[:, :N_sec, :]
    for li, (w, bb) in enumerate(params["fc"]):
        if li > 0:
            y = jnp.maximum(y, 0.0)
        y = jnp.einsum("bnf,fk->bnk", y.astype(jnp.bfloat16),
                       w.astype(jnp.bfloat16),
                       preferred_element_type=jnp.float32) + bb
    p = jnp.maximum(y, 0.0)
    avail = jnp.maximum(pT - jnp.sum(pP, axis=1), 0.0)
    ratio = jnp.minimum(avail / (jnp.sum(p, axis=(1, 2)) + 1e-5), 1.0)
    p = p * ratio[:, None, None]
    return jnp.where(p > threshold, p, 0.0)


if __name__ == "__main__":
    batch, N_prim, N_sec, N_antenna = 4, 2, 3, 4
    out_features_seq, heads_seq, fc_seq = (8, 8), (2, 2), (16, 4)
    P_tot = 10.0
    threshold = 0.001
    N = N_sec + 2 * N_prim                       # 7 graph nodes
    N_pad = ((N + 7) // 8) * 8                   # pad to sublane multiple -> 8

    key = jax.random.PRNGKey(0)
    key, kp, kh, kpp = jax.random.split(key, 4)
    params = init_params(kp, N_antenna, out_features_seq, heads_seq, fc_seq)
    adj = build_adjacency(N_prim, N_sec)

    h = jax.random.normal(kh, (batch, N, 2 * N_antenna), jnp.float32)
    pP = jnp.abs(jax.random.normal(kpp, (batch, N_prim), jnp.float32))

    TB = 2   # 2 samples folded per grid step -> G = 2 (megacore + pipelining)
    packed = pack_params(params, adj, N=N, N_pad=N_pad)

    p = gatnet_forward(packed, h, pP, P_tot, threshold, N=N, N_sec=N_sec, TB=TB)
    p = jax.block_until_ready(p)

    p_ref = reference_forward(params, adj, h, pP, P_tot, threshold, N_sec)
    assert p.shape == (batch, N_sec, fc_seq[-1]), p.shape
    # bf16 MXU inputs + approx softmax reciprocal + post-normalization order
    # -> loosened tolerance vs the f32 reference.
    assert jnp.allclose(p, p_ref, atol=5e-3, rtol=5e-2), (p, p_ref)

    print("KERNEL_OK")
</pallas_src>

<mosaic_0001>
module attributes {stable_mosaic.version = 11 : i64} {
  func.func @kernel(%arg0: i32, %arg1: memref<1xf32, #tpu.memory_space<smem>>, %arg2: memref<1x16x8xbf16, #tpu.memory_space<vmem>>, %arg3: memref<8x8xf32, #tpu.memory_space<vmem>>, %arg4: memref<8x16xbf16, #tpu.memory_space<vmem>>, %arg5: memref<16x2xf32, #tpu.memory_space<vmem>>, %arg6: memref<2x16xf32, #tpu.memory_space<vmem>>, %arg7: memref<2x16xf32, #tpu.memory_space<vmem>>, %arg8: memref<1x16xf32, #tpu.memory_space<vmem>>, %arg9: memref<16x16xbf16, #tpu.memory_space<vmem>>, %arg10: memref<16x2xf32, #tpu.memory_space<vmem>>, %arg11: memref<2x16xf32, #tpu.memory_space<vmem>>, %arg12: memref<2x16xf32, #tpu.memory_space<vmem>>, %arg13: memref<1x16xf32, #tpu.memory_space<vmem>>, %arg14: memref<16x16xbf16, #tpu.memory_space<vmem>>, %arg15: memref<1x16xf32, #tpu.memory_space<vmem>>, %arg16: memref<16x4xbf16, #tpu.memory_space<vmem>>, %arg17: memref<1x4xf32, #tpu.memory_space<vmem>>, %arg18: memref<1x2x2xf32, #tpu.memory_space<vmem>>, %arg19: memref<1x2x3x4xf32, #tpu.memory_space<vmem>>) attributes {dimension_semantics = [#tpu.dimension_semantics<parallel>], iteration_bounds = array<i64: 2>, scalar_prefetch = 0 : i64, scratch_operands = 0 : i64, tpu.core_type = #tpu.core_type<tc>, window_params = [{transform_indices = @transform_0, window_bounds = array<i64: 1>}, {transform_indices = @transform_1, window_bounds = array<i64: 1, 16, 8>}, {pipeline_mode = #tpu.pipeline_mode<synchronous>, transform_indices = @transform_2, window_bounds = array<i64: 8, 8>}, {pipeline_mode = #tpu.pipeline_mode<synchronous>, transform_indices = @transform_3, window_bounds = array<i64: 8, 16>}, {pipeline_mode = #tpu.pipeline_mode<synchronous>, transform_indices = @transform_4, window_bounds = array<i64: 16, 2>}, {pipeline_mode = #tpu.pipeline_mode<synchronous>, transform_indices = @transform_5, window_bounds = array<i64: 2, 16>}, {pipeline_mode = #tpu.pipeline_mode<synchronous>, transform_indices = @transform_6, window_bounds = array<i64: 2, 16>}, {pipeline_mode = #tpu.pipeline_mode<synchronous>, transform_indices = @transform_7, window_bounds = array<i64: 1, 16>}, {pipeline_mode = #tpu.pipeline_mode<synchronous>, transform_indices = @transform_8, window_bounds = array<i64: 16, 16>}, {pipeline_mode = #tpu.pipeline_mode<synchronous>, transform_indices = @transform_9, window_bounds = array<i64: 16, 2>}, {pipeline_mode = #tpu.pipeline_mode<synchronous>, transform_indices = @transform_10, window_bounds = array<i64: 2, 16>}, {pipeline_mode = #tpu.pipeline_mode<synchronous>, transform_indices = @transform_11, window_bounds = array<i64: 2, 16>}, {pipeline_mode = #tpu.pipeline_mode<synchronous>, transform_indices = @transform_12, window_bounds = array<i64: 1, 16>}, {pipeline_mode = #tpu.pipeline_mode<synchronous>, transform_indices = @transform_13, window_bounds = array<i64: 16, 16>}, {pipeline_mode = #tpu.pipeline_mode<synchronous>, transform_indices = @transform_14, window_bounds = array<i64: 1, 16>}, {pipeline_mode = #tpu.pipeline_mode<synchronous>, transform_indices = @transform_15, window_bounds = array<i64: 16, 4>}, {pipeline_mode = #tpu.pipeline_mode<synchronous>, transform_indices = @transform_16, window_bounds = array<i64: 1, 4>}, {transform_indices = @transform_17, window_bounds = array<i64: 1, 2, 2>}, {transform_indices = @transform_18, window_bounds = array<i64: 1, 2, 3, 4>}]} {
    %c0 = arith.constant 0 : index
    %c0_0 = arith.constant 0 : index
    %0 = vector.load %arg3[%c0, %c0_0] : memref<8x8xf32, #tpu.memory_space<vmem>>, vector<8x8xf32>
    %c0_1 = arith.constant 0 : index
    %c0_2 = arith.constant 0 : index
    %c0_3 = arith.constant 0 : index
    %1 = vector.load %arg2[%c0_1, %c0_2, %c0_3] : memref<1x16x8xbf16, #tpu.memory_space<vmem>>, vector<1x16x8xbf16>
    %2 = vector.shape_cast %1 : vector<1x16x8xbf16> to vector<16x8xbf16>
    %c0_4 = arith.constant 0 : index
    %c0_5 = arith.constant 0 : index
    %3 = vector.load %arg4[%c0_4, %c0_5] : memref<8x16xbf16, #tpu.memory_space<vmem>>, vector<8x16xbf16>
    %cst = arith.constant dense<0.000000e+00> : vector<16x16xf32>
    %4 = tpu.matmul %2, %3, %cst {dimension_numbers = #tpu.dot_dimension_numbers<[1], [0], [0], [1], [0, 0, 1, 1], [], []>} : vector<16x8xbf16>, vector<8x16xbf16>, vector<16x16xf32> -> vector<16x16xf32>
    %c0_6 = arith.constant 0 : index
    %c0_7 = arith.constant 0 : index
    %5 = vector.load %arg5[%c0_6, %c0_7] : memref<16x2xf32, #tpu.memory_space<vmem>>, vector<16x2xf32>
    %cst_8 = arith.constant dense<0.000000e+00> : vector<16x2xf32>
    %6 = tpu.matmul %4, %5, %cst_8 {dimension_numbers = #tpu.dot_dimension_numbers<[1], [0], [0], [1], [0, 0, 1, 1], [], []>} : vector<16x16xf32>, vector<16x2xf32>, vector<16x2xf32> -> vector<16x2xf32>
    %c0_9 = arith.constant 0 : index
    %c0_10 = arith.constant 0 : index
    %7 = vector.load %arg6[%c0_9, %c0_10] : memref<2x16xf32, #tpu.memory_space<vmem>>, vector<2x16xf32>
    %cst_11 = arith.constant dense<0.000000e+00> : vector<2x16xf32>
    %8 = tpu.matmul %7, %4, %cst_11 {dimension_numbers = #tpu.dot_dimension_numbers<[1], [1], [0], [0], [0, 0, 1, 0], [], []>} : vector<2x16xf32>, vector<16x16xf32>, vector<2x16xf32> -> vector<2x16xf32>
    %c0_12 = arith.constant 0 : index
    %c0_13 = arith.constant 0 : index
    %9 = vector.load %arg7[%c0_12, %c0_13] : memref<2x16xf32, #tpu.memory_space<vmem>>, vector<2x16xf32>
    %10 = arith.truncf %4 : vector<16x16xf32> to vector<16x16xbf16>
    %11 = vector.extract_strided_slice %10 {offsets = [0, 0], sizes = [8, 16], strides = [1, 1]} : vector<16x16xbf16> to vector<8x16xbf16>
    %cst_14 = arith.constant 0.000000e+00 : f32
    %12 = vector.broadcast %cst_14 : f32 to vector<8x16xf32>
    %13 = vector.extract_strided_slice %6 {offsets = [0, 0], sizes = [8, 1], strides = [1, 1]} : vector<16x2xf32> to vector<8x1xf32>
    %14 = vector.extract_strided_slice %8 {offsets = [0, 0], sizes = [1, 8], strides = [1, 1]} : vector<2x16xf32> to vector<1x8xf32>
    %15 = vector.shape_cast %14 : vector<1x8xf32> to vector<1x1x8xf32>
    %cst_15 = arith.constant dense<0xFF800000> : vector<1xf32>
    %16 = vector.multi_reduction <maximumf>, %15, %cst_15 [1, 2] : vector<1x1x8xf32> to vector<1xf32>
    %17 = vector.shape_cast %16 : vector<1xf32> to vector<1x1x1xf32>
    %18 = vector.extract %17[0, 0, 0] : f32 from vector<1x1x1xf32>
    %19 = vector.broadcast %18 : f32 to vector<8x1xf32>
    %20 = arith.addf %13, %19 : vector<8x1xf32>
    %cst_16 = arith.constant 0.000000e+00 : f32
    %21 = vector.broadcast %cst_16 : f32 to vector<8x1xf32>
    %22 = arith.cmpf ogt, %20, %21 : vector<8x1xf32>
    %cst_17 = arith.constant 2.000000e-01 : f32
    %23 = vector.broadcast %cst_17 : f32 to vector<8x1xf32>
    %24 = arith.mulf %23, %20 : vector<8x1xf32>
    %25 = arith.select %22, %20, %24 : vector<8x1xi1>, vector<8x1xf32>
    %26 = vector.broadcast %13 : vector<8x1xf32> to vector<8x8xf32>
    %27 = vector.broadcast %14 : vector<1x8xf32> to vector<8x8xf32>
    %28 = arith.addf %26, %27 : vector<8x8xf32>
    %cst_18 = arith.constant 0.000000e+00 : f32
    %29 = vector.broadcast %cst_18 : f32 to vector<8x8xf32>
    %30 = arith.cmpf ogt, %28, %29 : vector<8x8xf32>
    %cst_19 = arith.constant 2.000000e-01 : f32
    %31 = vector.broadcast %cst_19 : f32 to vector<8x8xf32>
    %32 = arith.mulf %31, %28 : vector<8x8xf32>
    %33 = arith.select %30, %28, %32 : vector<8x8xi1>, vector<8x8xf32>
    %34 = arith.addf %33, %0 : vector<8x8xf32>
    %35 = vector.broadcast %25 : vector<8x1xf32> to vector<8x8xf32>
    %36 = arith.subf %34, %35 : vector<8x8xf32>
    %37 = math.exp %36 : vector<8x8xf32>
    %cst_20 = arith.constant dense<0.000000e+00> : vector<8xf32>
    %38 = vector.multi_reduction <add>, %37, %cst_20 [1] : vector<8x8xf32> to vector<8xf32>
    %39 = vector.shape_cast %38 : vector<8xf32> to vector<8x1xf32>
    %40 = arith.truncf %37 : vector<8x8xf32> to vector<8x8xbf16>
    %cst_21 = arith.constant dense<0.000000e+00> : vector<8x16xf32>
    %41 = tpu.matmul %40, %11, %cst_21 {dimension_numbers = #tpu.dot_dimension_numbers<[1], [0], [0], [1], [0, 0, 1, 1], [], []>} : vector<8x8xbf16>, vector<8x16xbf16>, vector<8x16xf32> -> vector<8x16xf32>
    %42 = tpu.reciprocal %39 {approx = true} : vector<8x1xf32> -> vector<8x1xf32>
    %43 = vector.extract_strided_slice %9 {offsets = [0, 0], sizes = [1, 16], strides = [1, 1]} : vector<2x16xf32> to vector<1x16xf32>
    %44 = vector.broadcast %42 : vector<8x1xf32> to vector<8x16xf32>
    %45 = vector.broadcast %43 : vector<1x16xf32> to vector<8x16xf32>
    %46 = arith.mulf %44, %45 : vector<8x16xf32>
    %47 = arith.mulf %41, %46 : vector<8x16xf32>
    %48 = arith.addf %12, %47 : vector<8x16xf32>
    %49 = vector.extract_strided_slice %6 {offsets = [0, 1], sizes = [8, 1], strides = [1, 1]} : vector<16x2xf32> to vector<8x1xf32>
    %50 = vector.extract_strided_slice %8 {offsets = [1, 0], sizes = [1, 8], strides = [1, 1]} : vector<2x16xf32> to vector<1x8xf32>
    %51 = vector.shape_cast %50 : vector<1x8xf32> to vector<1x1x8xf32>
    %cst_22 = arith.constant dense<0xFF800000> : vector<1xf32>
    %52 = vector.multi_reduction <maximumf>, %51, %cst_22 [1, 2] : vector<1x1x8xf32> to vector<1xf32>
    %53 = vector.shape_cast %52 : vector<1xf32> to vector<1x1x1xf32>
    %54 = vector.extract %53[0, 0, 0] : f32 from vector<1x1x1xf32>
    %55 = vector.broadcast %54 : f32 to vector<8x1xf32>
    %56 = arith.addf %49, %55 : vector<8x1xf32>
    %cst_23 = arith.constant 0.000000e+00 : f32
    %57 = vector.broadcast %cst_23 : f32 to vector<8x1xf32>
    %58 = arith.cmpf ogt, %56, %57 : vector<8x1xf32>
    %cst_24 = arith.constant 2.000000e-01 : f32
    %59 = vector.broadcast %cst_24 : f32 to vector<8x1xf32>
    %60 = arith.mulf %59, %56 : vector<8x1xf32>
    %61 = arith.select %58, %56, %60 : vector<8x1xi1>, vector<8x1xf32>
    %62 = vector.broadcast %49 : vector<8x1xf32> to vector<8x8xf32>
    %63 = vector.broadcast %50 : vector<1x8xf32> to vector<8x8xf32>
    %64 = arith.addf %62, %63 : vector<8x8xf32>
    %cst_25 = arith.constant 0.000000e+00 : f32
    %65 = vector.broadcast %cst_25 : f32 to vector<8x8xf32>
    %66 = arith.cmpf ogt, %64, %65 : vector<8x8xf32>
    %cst_26 = arith.constant 2.000000e-01 : f32
    %67 = vector.broadcast %cst_26 : f32 to vector<8x8xf32>
    %68 = arith.mulf %67, %64 : vector<8x8xf32>
    %69 = arith.select %66, %64, %68 : vector<8x8xi1>, vector<8x8xf32>
    %70 = arith.addf %69, %0 : vector<8x8xf32>
    %71 = vector.broadcast %61 : vector<8x1xf32> to vector<8x8xf32>
    %72 = arith.subf %70, %71 : vector<8x8xf32>
    %73 = math.exp %72 : vector<8x8xf32>
    %cst_27 = arith.constant dense<0.000000e+00> : vector<8xf32>
    %74 = vector.multi_reduction <add>, %73, %cst_27 [1] : vector<8x8xf32> to vector<8xf32>
    %75 = vector.shape_cast %74 : vector<8xf32> to vector<8x1xf32>
    %76 = arith.truncf %73 : vector<8x8xf32> to vector<8x8xbf16>
    %cst_28 = arith.constant dense<0.000000e+00> : vector<8x16xf32>
    %77 = tpu.matmul %76, %11, %cst_28 {dimension_numbers = #tpu.dot_dimension_numbers<[1], [0], [0], [1], [0, 0, 1, 1], [], []>} : vector<8x8xbf16>, vector<8x16xbf16>, vector<8x16xf32> -> vector<8x16xf32>
    %78 = tpu.reciprocal %75 {approx = true} : vector<8x1xf32> -> vector<8x1xf32>
    %79 = vector.extract_strided_slice %9 {offsets = [1, 0], sizes = [1, 16], strides = [1, 1]} : vector<2x16xf32> to vector<1x16xf32>
    %80 = vector.broadcast %78 : vector<8x1xf32> to vector<8x16xf32>
    %81 = vector.broadcast %79 : vector<1x16xf32> to vector<8x16xf32>
    %82 = arith.mulf %80, %81 : vector<8x16xf32>
    %83 = arith.mulf %77, %82 : vector<8x16xf32>
    %84 = arith.addf %48, %83 : vector<8x16xf32>
    %85 = vector.extract_strided_slice %10 {offsets = [8, 0], sizes = [8, 16], strides = [1, 1]} : vector<16x16xbf16> to vector<8x16xbf16>
    %cst_29 = arith.constant 0.000000e+00 : f32
    %86 = vector.broadcast %cst_29 : f32 to vector<8x16xf32>
    %87 = vector.extract_strided_slice %6 {offsets = [8, 0], sizes = [8, 1], strides = [1, 1]} : vector<16x2xf32> to vector<8x1xf32>
    %88 = vector.extract_strided_slice %8 {offsets = [0, 8], sizes = [1, 8], strides = [1, 1]} : vector<2x16xf32> to vector<1x8xf32>
    %89 = vector.shape_cast %88 : vector<1x8xf32> to vector<1x1x8xf32>
    %cst_30 = arith.constant dense<0xFF800000> : vector<1xf32>
    %90 = vector.multi_reduction <maximumf>, %89, %cst_30 [1, 2] : vector<1x1x8xf32> to vector<1xf32>
    %91 = vector.shape_cast %90 : vector<1xf32> to vector<1x1x1xf32>
    %92 = vector.extract %91[0, 0, 0] : f32 from vector<1x1x1xf32>
    %93 = vector.broadcast %92 : f32 to vector<8x1xf32>
    %94 = arith.addf %87, %93 : vector<8x1xf32>
    %cst_31 = arith.constant 0.000000e+00 : f32
    %95 = vector.broadcast %cst_31 : f32 to vector<8x1xf32>
    %96 = arith.cmpf ogt, %94, %95 : vector<8x1xf32>
    %cst_32 = arith.constant 2.000000e-01 : f32
    %97 = vector.broadcast %cst_32 : f32 to vector<8x1xf32>
    %98 = arith.mulf %97, %94 : vector<8x1xf32>
    %99 = arith.select %96, %94, %98 : vector<8x1xi1>, vector<8x1xf32>
    %100 = vector.broadcast %87 : vector<8x1xf32> to vector<8x8xf32>
    %101 = vector.broadcast %88 : vector<1x8xf32> to vector<8x8xf32>
    %102 = arith.addf %100, %101 : vector<8x8xf32>
    %cst_33 = arith.constant 0.000000e+00 : f32
    %103 = vector.broadcast %cst_33 : f32 to vector<8x8xf32>
    %104 = arith.cmpf ogt, %102, %103 : vector<8x8xf32>
    %cst_34 = arith.constant 2.000000e-01 : f32
    %105 = vector.broadcast %cst_34 : f32 to vector<8x8xf32>
    %106 = arith.mulf %105, %102 : vector<8x8xf32>
    %107 = arith.select %104, %102, %106 : vector<8x8xi1>, vector<8x8xf32>
    %108 = arith.addf %107, %0 : vector<8x8xf32>
    %109 = vector.broadcast %99 : vector<8x1xf32> to vector<8x8xf32>
    %110 = arith.subf %108, %109 : vector<8x8xf32>
    %111 = math.exp %110 : vector<8x8xf32>
    %cst_35 = arith.constant dense<0.000000e+00> : vector<8xf32>
    %112 = vector.multi_reduction <add>, %111, %cst_35 [1] : vector<8x8xf32> to vector<8xf32>
    %113 = vector.shape_cast %112 : vector<8xf32> to vector<8x1xf32>
    %114 = arith.truncf %111 : vector<8x8xf32> to vector<8x8xbf16>
    %cst_36 = arith.constant dense<0.000000e+00> : vector<8x16xf32>
    %115 = tpu.matmul %114, %85, %cst_36 {dimension_numbers = #tpu.dot_dimension_numbers<[1], [0], [0], [1], [0, 0, 1, 1], [], []>} : vector<8x8xbf16>, vector<8x16xbf16>, vector<8x16xf32> -> vector<8x16xf32>
    %116 = tpu.reciprocal %113 {approx = true} : vector<8x1xf32> -> vector<8x1xf32>
    %117 = vector.extract_strided_slice %9 {offsets = [0, 0], sizes = [1, 16], strides = [1, 1]} : vector<2x16xf32> to vector<1x16xf32>
    %118 = vector.broadcast %116 : vector<8x1xf32> to vector<8x16xf32>
    %119 = vector.broadcast %117 : vector<1x16xf32> to vector<8x16xf32>
    %120 = arith.mulf %118, %119 : vector<8x16xf32>
    %121 = arith.mulf %115, %120 : vector<8x16xf32>
    %122 = arith.addf %86, %121 : vector<8x16xf32>
    %123 = vector.extract_strided_slice %6 {offsets = [8, 1], sizes = [8, 1], strides = [1, 1]} : vector<16x2xf32> to vector<8x1xf32>
    %124 = vector.extract_strided_slice %8 {offsets = [1, 8], sizes = [1, 8], strides = [1, 1]} : vector<2x16xf32> to vector<1x8xf32>
    %125 = vector.shape_cast %124 : vector<1x8xf32> to vector<1x1x8xf32>
    %cst_37 = arith.constant dense<0xFF800000> : vector<1xf32>
    %126 = vector.multi_reduction <maximumf>, %125, %cst_37 [1, 2] : vector<1x1x8xf32> to vector<1xf32>
    %127 = vector.shape_cast %126 : vector<1xf32> to vector<1x1x1xf32>
    %128 = vector.extract %127[0, 0, 0] : f32 from vector<1x1x1xf32>
    %129 = vector.broadcast %128 : f32 to vector<8x1xf32>
    %130 = arith.addf %123, %129 : vector<8x1xf32>
    %cst_38 = arith.constant 0.000000e+00 : f32
    %131 = vector.broadcast %cst_38 : f32 to vector<8x1xf32>
    %132 = arith.cmpf ogt, %130, %131 : vector<8x1xf32>
    %cst_39 = arith.constant 2.000000e-01 : f32
    %133 = vector.broadcast %cst_39 : f32 to vector<8x1xf32>
    %134 = arith.mulf %133, %130 : vector<8x1xf32>
    %135 = arith.select %132, %130, %134 : vector<8x1xi1>, vector<8x1xf32>
    %136 = vector.broadcast %123 : vector<8x1xf32> to vector<8x8xf32>
    %137 = vector.broadcast %124 : vector<1x8xf32> to vector<8x8xf32>
    %138 = arith.addf %136, %137 : vector<8x8xf32>
    %cst_40 = arith.constant 0.000000e+00 : f32
    %139 = vector.broadcast %cst_40 : f32 to vector<8x8xf32>
    %140 = arith.cmpf ogt, %138, %139 : vector<8x8xf32>
    %cst_41 = arith.constant 2.000000e-01 : f32
    %141 = vector.broadcast %cst_41 : f32 to vector<8x8xf32>
    %142 = arith.mulf %141, %138 : vector<8x8xf32>
    %143 = arith.select %140, %138, %142 : vector<8x8xi1>, vector<8x8xf32>
    %144 = arith.addf %143, %0 : vector<8x8xf32>
    %145 = vector.broadcast %135 : vector<8x1xf32> to vector<8x8xf32>
    %146 = arith.subf %144, %145 : vector<8x8xf32>
    %147 = math.exp %146 : vector<8x8xf32>
    %cst_42 = arith.constant dense<0.000000e+00> : vector<8xf32>
    %148 = vector.multi_reduction <add>, %147, %cst_42 [1] : vector<8x8xf32> to vector<8xf32>
    %149 = vector.shape_cast %148 : vector<8xf32> to vector<8x1xf32>
    %150 = arith.truncf %147 : vector<8x8xf32> to vector<8x8xbf16>
    %cst_43 = arith.constant dense<0.000000e+00> : vector<8x16xf32>
    %151 = tpu.matmul %150, %85, %cst_43 {dimension_numbers = #tpu.dot_dimension_numbers<[1], [0], [0], [1], [0, 0, 1, 1], [], []>} : vector<8x8xbf16>, vector<8x16xbf16>, vector<8x16xf32> -> vector<8x16xf32>
    %152 = tpu.reciprocal %149 {approx = true} : vector<8x1xf32> -> vector<8x1xf32>
    %153 = vector.extract_strided_slice %9 {offsets = [1, 0], sizes = [1, 16], strides = [1, 1]} : vector<2x16xf32> to vector<1x16xf32>
    %154 = vector.broadcast %152 : vector<8x1xf32> to vector<8x16xf32>
    %155 = vector.broadcast %153 : vector<1x16xf32> to vector<8x16xf32>
    %156 = arith.mulf %154, %155 : vector<8x16xf32>
    %157 = arith.mulf %151, %156 : vector<8x16xf32>
    %158 = arith.addf %122, %157 : vector<8x16xf32>
    %159 = tpu.concatenate %84, %158 in 0 : vector<8x16xf32>, vector<8x16xf32> -> vector<16x16xf32>
    %c0_44 = arith.constant 0 : index
    %c0_45 = arith.constant 0 : index
    %160 = vector.load %arg8[%c0_44, %c0_45] : memref<1x16xf32, #tpu.memory_space<vmem>>, vector<1x16xf32>
    %161 = vector.broadcast %160 : vector<1x16xf32> to vector<16x16xf32>
    %162 = arith.addf %159, %161 : vector<16x16xf32>
    %cst_46 = arith.constant 0.000000e+00 : f32
    %163 = vector.broadcast %cst_46 : f32 to vector<16x16xf32>
    %164 = arith.maximumf %162, %163 : vector<16x16xf32>
    %165 = arith.truncf %164 : vector<16x16xf32> to vector<16x16xbf16>
    %c0_47 = arith.constant 0 : index
    %c0_48 = arith.constant 0 : index
    %166 = vector.load %arg9[%c0_47, %c0_48] : memref<16x16xbf16, #tpu.memory_space<vmem>>, vector<16x16xbf16>
    %cst_49 = arith.constant dense<0.000000e+00> : vector<16x16xf32>
    %167 = tpu.matmul %165, %166, %cst_49 {dimension_numbers = #tpu.dot_dimension_numbers<[1], [0], [0], [1], [0, 0, 1, 1], [], []>} : vector<16x16xbf16>, vector<16x16xbf16>, vector<16x16xf32> -> vector<16x16xf32>
    %c0_50 = arith.constant 0 : index
    %c0_51 = arith.constant 0 : index
    %168 = vector.load %arg10[%c0_50, %c0_51] : memref<16x2xf32, #tpu.memory_space<vmem>>, vector<16x2xf32>
    %cst_52 = arith.constant dense<0.000000e+00> : vector<16x2xf32>
    %169 = tpu.matmul %167, %168, %cst_52 {dimension_numbers = #tpu.dot_dimension_numbers<[1], [0], [0], [1], [0, 0, 1, 1], [], []>} : vector<16x16xf32>, vector<16x2xf32>, vector<16x2xf32> -> vector<16x2xf32>
    %c0_53 = arith.constant 0 : index
    %c0_54 = arith.constant 0 : index
    %170 = vector.load %arg11[%c0_53, %c0_54] : memref<2x16xf32, #tpu.memory_space<vmem>>, vector<2x16xf32>
    %cst_55 = arith.constant dense<0.000000e+00> : vector<2x16xf32>
    %171 = tpu.matmul %170, %167, %cst_55 {dimension_numbers = #tpu.dot_dimension_numbers<[1], [1], [0], [0], [0, 0, 1, 0], [], []>} : vector<2x16xf32>, vector<16x16xf32>, vector<2x16xf32> -> vector<2x16xf32>
    %c0_56 = arith.constant 0 : index
    %c0_57 = arith.constant 0 : index
    %172 = vector.load %arg12[%c0_56, %c0_57] : memref<2x16xf32, #tpu.memory_space<vmem>>, vector<2x16xf32>
    %173 = arith.truncf %167 : vector<16x16xf32> to vector<16x16xbf16>
    %174 = vector.extract_strided_slice %173 {offsets = [0, 0], sizes = [8, 16], strides = [1, 1]} : vector<16x16xbf16> to vector<8x16xbf16>
    %cst_58 = arith.constant 0.000000e+00 : f32
    %175 = vector.broadcast %cst_58 : f32 to vector<8x16xf32>
    %176 = vector.extract_strided_slice %169 {offsets = [0, 0], sizes = [8, 1], strides = [1, 1]} : vector<16x2xf32> to vector<8x1xf32>
    %177 = vector.extract_strided_slice %171 {offsets = [0, 0], sizes = [1, 8], strides = [1, 1]} : vector<2x16xf32> to vector<1x8xf32>
    %178 = vector.shape_cast %177 : vector<1x8xf32> to vector<1x1x8xf32>
    %cst_59 = arith.constant dense<0xFF800000> : vector<1xf32>
    %179 = vector.multi_reduction <maximumf>, %178, %cst_59 [1, 2] : vector<1x1x8xf32> to vector<1xf32>
    %180 = vector.shape_cast %179 : vector<1xf32> to vector<1x1x1xf32>
    %181 = vector.extract %180[0, 0, 0] : f32 from vector<1x1x1xf32>
    %182 = vector.broadcast %181 : f32 to vector<8x1xf32>
    %183 = arith.addf %176, %182 : vector<8x1xf32>
    %cst_60 = arith.constant 0.000000e+00 : f32
    %184 = vector.broadcast %cst_60 : f32 to vector<8x1xf32>
    %185 = arith.cmpf ogt, %183, %184 : vector<8x1xf32>
    %cst_61 = arith.constant 2.000000e-01 : f32
    %186 = vector.broadcast %cst_61 : f32 to vector<8x1xf32>
    %187 = arith.mulf %186, %183 : vector<8x1xf32>
    %188 = arith.select %185, %183, %187 : vector<8x1xi1>, vector<8x1xf32>
    %189 = vector.broadcast %176 : vector<8x1xf32> to vector<8x8xf32>
    %190 = vector.broadcast %177 : vector<1x8xf32> to vector<8x8xf32>
    %191 = arith.addf %189, %190 : vector<8x8xf32>
    %cst_62 = arith.constant 0.000000e+00 : f32
    %192 = vector.broadcast %cst_62 : f32 to vector<8x8xf32>
    %193 = arith.cmpf ogt, %191, %192 : vector<8x8xf32>
    %cst_63 = arith.constant 2.000000e-01 : f32
    %194 = vector.broadcast %cst_63 : f32 to vector<8x8xf32>
    %195 = arith.mulf %194, %191 : vector<8x8xf32>
    %196 = arith.select %193, %191, %195 : vector<8x8xi1>, vector<8x8xf32>
    %197 = arith.addf %196, %0 : vector<8x8xf32>
    %198 = vector.broadcast %188 : vector<8x1xf32> to vector<8x8xf32>
    %199 = arith.subf %197, %198 : vector<8x8xf32>
    %200 = math.exp %199 : vector<8x8xf32>
    %cst_64 = arith.constant dense<0.000000e+00> : vector<8xf32>
    %201 = vector.multi_reduction <add>, %200, %cst_64 [1] : vector<8x8xf32> to vector<8xf32>
    %202 = vector.shape_cast %201 : vector<8xf32> to vector<8x1xf32>
    %203 = arith.truncf %200 : vector<8x8xf32> to vector<8x8xbf16>
    %cst_65 = arith.constant dense<0.000000e+00> : vector<8x16xf32>
    %204 = tpu.matmul %203, %174, %cst_65 {dimension_numbers = #tpu.dot_dimension_numbers<[1], [0], [0], [1], [0, 0, 1, 1], [], []>} : vector<8x8xbf16>, vector<8x16xbf16>, vector<8x16xf32> -> vector<8x16xf32>
    %205 = tpu.reciprocal %202 {approx = true} : vector<8x1xf32> -> vector<8x1xf32>
    %206 = vector.extract_strided_slice %172 {offsets = [0, 0], sizes = [1, 16], strides = [1, 1]} : vector<2x16xf32> to vector<1x16xf32>
    %207 = vector.broadcast %205 : vector<8x1xf32> to vector<8x16xf32>
    %208 = vector.broadcast %206 : vector<1x16xf32> to vector<8x16xf32>
    %209 = arith.mulf %207, %208 : vector<8x16xf32>
    %210 = arith.mulf %204, %209 : vector<8x16xf32>
    %211 = arith.addf %175, %210 : vector<8x16xf32>
    %212 = vector.extract_strided_slice %169 {offsets = [0, 1], sizes = [8, 1], strides = [1, 1]} : vector<16x2xf32> to vector<8x1xf32>
    %213 = vector.extract_strided_slice %171 {offsets = [1, 0], sizes = [1, 8], strides = [1, 1]} : vector<2x16xf32> to vector<1x8xf32>
    %214 = vector.shape_cast %213 : vector<1x8xf32> to vector<1x1x8xf32>
    %cst_66 = arith.constant dense<0xFF800000> : vector<1xf32>
    %215 = vector.multi_reduction <maximumf>, %214, %cst_66 [1, 2] : vector<1x1x8xf32> to vector<1xf32>
    %216 = vector.shape_cast %215 : vector<1xf32> to vector<1x1x1xf32>
    %217 = vector.extract %216[0, 0, 0] : f32 from vector<1x1x1xf32>
    %218 = vector.broadcast %217 : f32 to vector<8x1xf32>
    %219 = arith.addf %212, %218 : vector<8x1xf32>
    %cst_67 = arith.constant 0.000000e+00 : f32
    %220 = vector.broadcast %cst_67 : f32 to vector<8x1xf32>
    %221 = arith.cmpf ogt, %219, %220 : vector<8x1xf32>
    %cst_68 = arith.constant 2.000000e-01 : f32
    %222 = vector.broadcast %cst_68 : f32 to vector<8x1xf32>
    %223 = arith.mulf %222, %219 : vector<8x1xf32>
    %224 = arith.select %221, %219, %223 : vector<8x1xi1>, vector<8x1xf32>
    %225 = vector.broadcast %212 : vector<8x1xf32> to vector<8x8xf32>
    %226 = vector.broadcast %213 : vector<1x8xf32> to vector<8x8xf32>
    %227 = arith.addf %225, %226 : vector<8x8xf32>
    %cst_69 = arith.constant 0.000000e+00 : f32
    %228 = vector.broadcast %cst_69 : f32 to vector<8x8xf32>
    %229 = arith.cmpf ogt, %227, %228 : vector<8x8xf32>
    %cst_70 = arith.constant 2.000000e-01 : f32
    %230 = vector.broadcast %cst_70 : f32 to vector<8x8xf32>
    %231 = arith.mulf %230, %227 : vector<8x8xf32>
    %232 = arith.select %229, %227, %231 : vector<8x8xi1>, vector<8x8xf32>
    %233 = arith.addf %232, %0 : vector<8x8xf32>
    %234 = vector.broadcast %224 : vector<8x1xf32> to vector<8x8xf32>
    %235 = arith.subf %233, %234 : vector<8x8xf32>
    %236 = math.exp %235 : vector<8x8xf32>
    %cst_71 = arith.constant dense<0.000000e+00> : vector<8xf32>
    %237 = vector.multi_reduction <add>, %236, %cst_71 [1] : vector<8x8xf32> to vector<8xf32>
    %238 = vector.shape_cast %237 : vector<8xf32> to vector<8x1xf32>
    %239 = arith.truncf %236 : vector<8x8xf32> to vector<8x8xbf16>
    %cst_72 = arith.constant dense<0.000000e+00> : vector<8x16xf32>
    %240 = tpu.matmul %239, %174, %cst_72 {dimension_numbers = #tpu.dot_dimension_numbers<[1], [0], [0], [1], [0, 0, 1, 1], [], []>} : vector<8x8xbf16>, vector<8x16xbf16>, vector<8x16xf32> -> vector<8x16xf32>
    %241 = tpu.reciprocal %238 {approx = true} : vector<8x1xf32> -> vector<8x1xf32>
    %242 = vector.extract_strided_slice %172 {offsets = [1, 0], sizes = [1, 16], strides = [1, 1]} : vector<2x16xf32> to vector<1x16xf32>
    %243 = vector.broadcast %241 : vector<8x1xf32> to vector<8x16xf32>
    %244 = vector.broadcast %242 : vector<1x16xf32> to vector<8x16xf32>
    %245 = arith.mulf %243, %244 : vector<8x16xf32>
    %246 = arith.mulf %240, %245 : vector<8x16xf32>
    %247 = arith.addf %211, %246 : vector<8x16xf32>
    %248 = vector.extract_strided_slice %173 {offsets = [8, 0], sizes = [8, 16], strides = [1, 1]} : vector<16x16xbf16> to vector<8x16xbf16>
    %cst_73 = arith.constant 0.000000e+00 : f32
    %249 = vector.broadcast %cst_73 : f32 to vector<8x16xf32>
    %250 = vector.extract_strided_slice %169 {offsets = [8, 0], sizes = [8, 1], strides = [1, 1]} : vector<16x2xf32> to vector<8x1xf32>
    %251 = vector.extract_strided_slice %171 {offsets = [0, 8], sizes = [1, 8], strides = [1, 1]} : vector<2x16xf32> to vector<1x8xf32>
    %252 = vector.shape_cast %251 : vector<1x8xf32> to vector<1x1x8xf32>
    %cst_74 = arith.constant dense<0xFF800000> : vector<1xf32>
    %253 = vector.multi_reduction <maximumf>, %252, %cst_74 [1, 2] : vector<1x1x8xf32> to vector<1xf32>
    %254 = vector.shape_cast %253 : vector<1xf32> to vector<1x1x1xf32>
    %255 = vector.extract %254[0, 0, 0] : f32 from vector<1x1x1xf32>
    %256 = vector.broadcast %255 : f32 to vector<8x1xf32>
    %257 = arith.addf %250, %256 : vector<8x1xf32>
    %cst_75 = arith.constant 0.000000e+00 : f32
    %258 = vector.broadcast %cst_75 : f32 to vector<8x1xf32>
    %259 = arith.cmpf ogt, %257, %258 : vector<8x1xf32>
    %cst_76 = arith.constant 2.000000e-01 : f32
    %260 = vector.broadcast %cst_76 : f32 to vector<8x1xf32>
    %261 = arith.mulf %260, %257 : vector<8x1xf32>
    %262 = arith.select %259, %257, %261 : vector<8x1xi1>, vector<8x1xf32>
    %263 = vector.broadcast %250 : vector<8x1xf32> to vector<8x8xf32>
    %264 = vector.broadcast %251 : vector<1x8xf32> to vector<8x8xf32>
    %265 = arith.addf %263, %264 : vector<8x8xf32>
    %cst_77 = arith.constant 0.000000e+00 : f32
    %266 = vector.broadcast %cst_77 : f32 to vector<8x8xf32>
    %267 = arith.cmpf ogt, %265, %266 : vector<8x8xf32>
    %cst_78 = arith.constant 2.000000e-01 : f32
    %268 = vector.broadcast %cst_78 : f32 to vector<8x8xf32>
    %269 = arith.mulf %268, %265 : vector<8x8xf32>
    %270 = arith.select %267, %265, %269 : vector<8x8xi1>, vector<8x8xf32>
    %271 = arith.addf %270, %0 : vector<8x8xf32>
    %272 = vector.broadcast %262 : vector<8x1xf32> to vector<8x8xf32>
    %273 = arith.subf %271, %272 : vector<8x8xf32>
    %274 = math.exp %273 : vector<8x8xf32>
    %cst_79 = arith.constant dense<0.000000e+00> : vector<8xf32>
    %275 = vector.multi_reduction <add>, %274, %cst_79 [1] : vector<8x8xf32> to vector<8xf32>
    %276 = vector.shape_cast %275 : vector<8xf32> to vector<8x1xf32>
    %277 = arith.truncf %274 : vector<8x8xf32> to vector<8x8xbf16>
    %cst_80 = arith.constant dense<0.000000e+00> : vector<8x16xf32>
    %278 = tpu.matmul %277, %248, %cst_80 {dimension_numbers = #tpu.dot_dimension_numbers<[1], [0], [0], [1], [0, 0, 1, 1], [], []>} : vector<8x8xbf16>, vector<8x16xbf16>, vector<8x16xf32> -> vector<8x16xf32>
    %279 = tpu.reciprocal %276 {approx = true} : vector<8x1xf32> -> vector<8x1xf32>
    %280 = vector.extract_strided_slice %172 {offsets = [0, 0], sizes = [1, 16], strides = [1, 1]} : vector<2x16xf32> to vector<1x16xf32>
    %281 = vector.broadcast %279 : vector<8x1xf32> to vector<8x16xf32>
    %282 = vector.broadcast %280 : vector<1x16xf32> to vector<8x16xf32>
    %283 = arith.mulf %281, %282 : vector<8x16xf32>
    %284 = arith.mulf %278, %283 : vector<8x16xf32>
    %285 = arith.addf %249, %284 : vector<8x16xf32>
    %286 = vector.extract_strided_slice %169 {offsets = [8, 1], sizes = [8, 1], strides = [1, 1]} : vector<16x2xf32> to vector<8x1xf32>
    %287 = vector.extract_strided_slice %171 {offsets = [1, 8], sizes = [1, 8], strides = [1, 1]} : vector<2x16xf32> to vector<1x8xf32>
    %288 = vector.shape_cast %287 : vector<1x8xf32> to vector<1x1x8xf32>
    %cst_81 = arith.constant dense<0xFF800000> : vector<1xf32>
    %289 = vector.multi_reduction <maximumf>, %288, %cst_81 [1, 2] : vector<1x1x8xf32> to vector<1xf32>
    %290 = vector.shape_cast %289 : vector<1xf32> to vector<1x1x1xf32>
    %291 = vector.extract %290[0, 0, 0] : f32 from vector<1x1x1xf32>
    %292 = vector.broadcast %291 : f32 to vector<8x1xf32>
    %293 = arith.addf %286, %292 : vector<8x1xf32>
    %cst_82 = arith.constant 0.000000e+00 : f32
    %294 = vector.broadcast %cst_82 : f32 to vector<8x1xf32>
    %295 = arith.cmpf ogt, %293, %294 : vector<8x1xf32>
    %cst_83 = arith.constant 2.000000e-01 : f32
    %296 = vector.broadcast %cst_83 : f32 to vector<8x1xf32>
    %297 = arith.mulf %296, %293 : vector<8x1xf32>
    %298 = arith.select %295, %293, %297 : vector<8x1xi1>, vector<8x1xf32>
    %299 = vector.broadcast %286 : vector<8x1xf32> to vector<8x8xf32>
    %300 = vector.broadcast %287 : vector<1x8xf32> to vector<8x8xf32>
    %301 = arith.addf %299, %300 : vector<8x8xf32>
    %cst_84 = arith.constant 0.000000e+00 : f32
    %302 = vector.broadcast %cst_84 : f32 to vector<8x8xf32>
    %303 = arith.cmpf ogt, %301, %302 : vector<8x8xf32>
    %cst_85 = arith.constant 2.000000e-01 : f32
    %304 = vector.broadcast %cst_85 : f32 to vector<8x8xf32>
    %305 = arith.mulf %304, %301 : vector<8x8xf32>
    %306 = arith.select %303, %301, %305 : vector<8x8xi1>, vector<8x8xf32>
    %307 = arith.addf %306, %0 : vector<8x8xf32>
    %308 = vector.broadcast %298 : vector<8x1xf32> to vector<8x8xf32>
    %309 = arith.subf %307, %308 : vector<8x8xf32>
    %310 = math.exp %309 : vector<8x8xf32>
    %cst_86 = arith.constant dense<0.000000e+00> : vector<8xf32>
    %311 = vector.multi_reduction <add>, %310, %cst_86 [1] : vector<8x8xf32> to vector<8xf32>
    %312 = vector.shape_cast %311 : vector<8xf32> to vector<8x1xf32>
    %313 = arith.truncf %310 : vector<8x8xf32> to vector<8x8xbf16>
    %cst_87 = arith.constant dense<0.000000e+00> : vector<8x16xf32>
    %314 = tpu.matmul %313, %248, %cst_87 {dimension_numbers = #tpu.dot_dimension_numbers<[1], [0], [0], [1], [0, 0, 1, 1], [], []>} : vector<8x8xbf16>, vector<8x16xbf16>, vector<8x16xf32> -> vector<8x16xf32>
    %315 = tpu.reciprocal %312 {approx = true} : vector<8x1xf32> -> vector<8x1xf32>
    %316 = vector.extract_strided_slice %172 {offsets = [1, 0], sizes = [1, 16], strides = [1, 1]} : vector<2x16xf32> to vector<1x16xf32>
    %317 = vector.broadcast %315 : vector<8x1xf32> to vector<8x16xf32>
    %318 = vector.broadcast %316 : vector<1x16xf32> to vector<8x16xf32>
    %319 = arith.mulf %317, %318 : vector<8x16xf32>
    %320 = arith.mulf %314, %319 : vector<8x16xf32>
    %321 = arith.addf %285, %320 : vector<8x16xf32>
    %322 = tpu.concatenate %247, %321 in 0 : vector<8x16xf32>, vector<8x16xf32> -> vector<16x16xf32>
    %c0_88 = arith.constant 0 : index
    %c0_89 = arith.constant 0 : index
    %323 = vector.load %arg13[%c0_88, %c0_89] : memref<1x16xf32, #tpu.memory_space<vmem>>, vector<1x16xf32>
    %324 = vector.broadcast %323 : vector<1x16xf32> to vector<16x16xf32>
    %325 = arith.addf %322, %324 : vector<16x16xf32>
    %cst_90 = arith.constant 0.000000e+00 : f32
    %326 = vector.broadcast %cst_90 : f32 to vector<16x16xf32>
    %327 = arith.maximumf %325, %326 : vector<16x16xf32>
    %328 = arith.truncf %327 : vector<16x16xf32> to vector<16x16xbf16>
    %c0_91 = arith.constant 0 : index
    %c0_92 = arith.constant 0 : index
    %329 = vector.load %arg14[%c0_91, %c0_92] : memref<16x16xbf16, #tpu.memory_space<vmem>>, vector<16x16xbf16>
    %cst_93 = arith.constant dense<0.000000e+00> : vector<16x16xf32>
    %330 = tpu.matmul %328, %329, %cst_93 {dimension_numbers = #tpu.dot_dimension_numbers<[1], [0], [0], [1], [0, 0, 1, 1], [], []>} : vector<16x16xbf16>, vector<16x16xbf16>, vector<16x16xf32> -> vector<16x16xf32>
    %c0_94 = arith.constant 0 : index
    %c0_95 = arith.constant 0 : index
    %331 = vector.load %arg15[%c0_94, %c0_95] : memref<1x16xf32, #tpu.memory_space<vmem>>, vector<1x16xf32>
    %332 = vector.broadcast %331 : vector<1x16xf32> to vector<16x16xf32>
    %333 = arith.addf %330, %332 : vector<16x16xf32>
    %cst_96 = arith.constant 0.000000e+00 : f32
    %334 = vector.broadcast %cst_96 : f32 to vector<16x16xf32>
    %335 = arith.maximumf %333, %334 : vector<16x16xf32>
    %336 = arith.truncf %335 : vector<16x16xf32> to vector<16x16xbf16>
    %c0_97 = arith.constant 0 : index
    %c0_98 = arith.constant 0 : index
    %337 = vector.load %arg16[%c0_97, %c0_98] : memref<16x4xbf16, #tpu.memory_space<vmem>>, vector<16x4xbf16>
    %cst_99 = arith.constant dense<0.000000e+00> : vector<16x4xf32>
    %338 = tpu.matmul %336, %337, %cst_99 {dimension_numbers = #tpu.dot_dimension_numbers<[1], [0], [0], [1], [0, 0, 1, 1], [], []>} : vector<16x16xbf16>, vector<16x4xbf16>, vector<16x4xf32> -> vector<16x4xf32>
    %c0_100 = arith.constant 0 : index
    %c0_101 = arith.constant 0 : index
    %339 = vector.load %arg17[%c0_100, %c0_101] : memref<1x4xf32, #tpu.memory_space<vmem>>, vector<1x4xf32>
    %340 = vector.broadcast %339 : vector<1x4xf32> to vector<16x4xf32>
    %341 = arith.addf %338, %340 : vector<16x4xf32>
    %cst_102 = arith.constant 0.000000e+00 : f32
    %342 = vector.broadcast %cst_102 : f32 to vector<16x4xf32>
    %343 = arith.maximumf %341, %342 : vector<16x4xf32>
    %c0_103 = arith.constant 0 : index
    %c0_104 = arith.constant 0 : index
    %c0_105 = arith.constant 0 : index
    %344 = vector.load %arg18[%c0_103, %c0_104, %c0_105] : memref<1x2x2xf32, #tpu.memory_space<vmem>>, vector<1x2x2xf32>
    %345 = vector.shape_cast %344 : vector<1x2x2xf32> to vector<2x2xf32>
    %c0_106 = arith.constant 0 : index
    %346 = memref.load %arg1[%c0_106] : memref<1xf32, #tpu.memory_space<smem>>
    %347 = vector.extract_strided_slice %343 {offsets = [0, 0], sizes = [3, 4], strides = [1, 1]} : vector<16x4xf32> to vector<3x4xf32>
    %348 = vector.shape_cast %347 : vector<3x4xf32> to vector<1x3x4xf32>
    %cst_107 = arith.constant dense<0.000000e+00> : vector<1xf32>
    %349 = vector.multi_reduction <add>, %348, %cst_107 [1, 2] : vector<1x3x4xf32> to vector<1xf32>
    %350 = vector.shape_cast %349 : vector<1xf32> to vector<1x1x1xf32>
    %351 = vector.extract %350[0, 0, 0] : f32 from vector<1x1x1xf32>
    %352 = vector.extract_strided_slice %345 {offsets = [0, 0], sizes = [1, 2], strides = [1, 1]} : vector<2x2xf32> to vector<1x2xf32>
    %353 = vector.shape_cast %352 : vector<1x2xf32> to vector<1x1x2xf32>
    %cst_108 = arith.constant dense<0.000000e+00> : vector<1xf32>
    %354 = vector.multi_reduction <add>, %353, %cst_108 [1, 2] : vector<1x1x2xf32> to vector<1xf32>
    %355 = vector.shape_cast %354 : vector<1xf32> to vector<1x1x1xf32>
    %356 = vector.extract %355[0, 0, 0] : f32 from vector<1x1x1xf32>
    %357 = arith.subf %346, %356 : f32
    %cst_109 = arith.constant 0.000000e+00 : f32
    %358 = arith.maximumf %357, %cst_109 : f32
    %cst_110 = arith.constant 9.99999974E-6 : f32
    %359 = arith.addf %351, %cst_110 : f32
    %360 = arith.divf %358, %359 : f32
    %cst_111 = arith.constant 1.000000e+00 : f32
    %361 = arith.minimumf %360, %cst_111 : f32
    %362 = vector.broadcast %361 : f32 to vector<3x4xf32>
    %363 = arith.mulf %347, %362 : vector<3x4xf32>
    %cst_112 = arith.constant 1.000000e-03 : f32
    %364 = vector.broadcast %cst_112 : f32 to vector<3x4xf32>
    %365 = arith.cmpf ogt, %363, %364 : vector<3x4xf32>
    %cst_113 = arith.constant 0.000000e+00 : f32
    %366 = vector.broadcast %cst_113 : f32 to vector<3x4xf32>
    %367 = arith.select %365, %363, %366 : vector<3x4xi1>, vector<3x4xf32>
    %c0_114 = arith.constant 0 : index
    %c0_115 = arith.constant 0 : index
    %c0_116 = arith.constant 0 : index
    %c0_117 = arith.constant 0 : index
    %368 = vector.load %arg19[%c0_114, %c0_115, %c0_116, %c0_117] : memref<1x2x3x4xf32, #tpu.memory_space<vmem>>, vector<1x1x3x4xf32>
    %369 = vector.shape_cast %368 : vector<1x1x3x4xf32> to vector<3x4xf32>
    %370 = vector.shape_cast %367 : vector<3x4xf32> to vector<1x1x3x4xf32>
    tpu.vector_store %arg19[%c0_114, %c0_115, %c0_116, %c0_117], %370 {strides = array<i32>} : memref<1x2x3x4xf32, #tpu.memory_space<vmem>>, vector<1x1x3x4xf32>,
    %371 = vector.extract_strided_slice %343 {offsets = [8, 0], sizes = [3, 4], strides = [1, 1]} : vector<16x4xf32> to vector<3x4xf32>
    %372 = vector.shape_cast %371 : vector<3x4xf32> to vector<1x3x4xf32>
    %cst_118 = arith.constant dense<0.000000e+00> : vector<1xf32>
    %373 = vector.multi_reduction <add>, %372, %cst_118 [1, 2] : vector<1x3x4xf32> to vector<1xf32>
    %374 = vector.shape_cast %373 : vector<1xf32> to vector<1x1x1xf32>
    %375 = vector.extract %374[0, 0, 0] : f32 from vector<1x1x1xf32>
    %376 = vector.extract_strided_slice %345 {offsets = [1, 0], sizes = [1, 2], strides = [1, 1]} : vector<2x2xf32> to vector<1x2xf32>
    %377 = vector.shape_cast %376 : vector<1x2xf32> to vector<1x1x2xf32>
    %cst_119 = arith.constant dense<0.000000e+00> : vector<1xf32>
    %378 = vector.multi_reduction <add>, %377, %cst_119 [1, 2] : vector<1x1x2xf32> to vector<1xf32>
    %379 = vector.shape_cast %378 : vector<1xf32> to vector<1x1x1xf32>
    %380 = vector.extract %379[0, 0, 0] : f32 from vector<1x1x1xf32>
    %381 = arith.subf %346, %380 : f32
    %cst_120 = arith.constant 0.000000e+00 : f32
    %382 = arith.maximumf %381, %cst_120 : f32
    %cst_121 = arith.constant 9.99999974E-6 : f32
    %383 = arith.addf %375, %cst_121 : f32
    %384 = arith.divf %382, %383 : f32
    %cst_122 = arith.constant 1.000000e+00 : f32
    %385 = arith.minimumf %384, %cst_122 : f32
    %386 = vector.broadcast %385 : f32 to vector<3x4xf32>
    %387 = arith.mulf %371, %386 : vector<3x4xf32>
    %cst_123 = arith.constant 1.000000e-03 : f32
    %388 = vector.broadcast %cst_123 : f32 to vector<3x4xf32>
    %389 = arith.cmpf ogt, %387, %388 : vector<3x4xf32>
    %cst_124 = arith.constant 0.000000e+00 : f32
    %390 = vector.broadcast %cst_124 : f32 to vector<3x4xf32>
    %391 = arith.select %389, %387, %390 : vector<3x4xi1>, vector<3x4xf32>
    %c0_125 = arith.constant 0 : index
    %c1 = arith.constant 1 : index
    %c0_126 = arith.constant 0 : index
    %c0_127 = arith.constant 0 : index
    %392 = vector.load %arg19[%c0_125, %c1, %c0_126, %c0_127] : memref<1x2x3x4xf32, #tpu.memory_space<vmem>>, vector<1x1x3x4xf32>
    %393 = vector.shape_cast %392 : vector<1x1x3x4xf32> to vector<3x4xf32>
    %394 = vector.shape_cast %391 : vector<3x4xf32> to vector<1x1x3x4xf32>
    tpu.vector_store %arg19[%c0_125, %c1, %c0_126, %c0_127], %394 {strides = array<i32>} : memref<1x2x3x4xf32, #tpu.memory_space<vmem>>, vector<1x1x3x4xf32>,
    return
  }
  func.func @transform_0(%arg0: i32) -> i32 {
    %c0_i32 = arith.constant 0 : i32
    %c0_i32_0 = arith.constant 0 : i32
    return %c0_i32 : i32
  }
  func.func @transform_1(%arg0: i32) -> (i32, i32, i32) {
    %c0_i32 = arith.constant 0 : i32
    %c0_i32_0 = arith.constant 0 : i32
    %c0_i32_1 = arith.constant 0 : i32
    return %arg0, %c0_i32, %c0_i32_0 : i32, i32, i32
  }
  func.func @transform_2(%arg0: i32) -> (i32, i32) {
    %c0_i32 = arith.constant 0 : i32
    %c0_i32_0 = arith.constant 0 : i32
    %c0_i32_1 = arith.constant 0 : i32
    return %c0_i32, %c0_i32_0 : i32, i32
  }
  func.func @transform_3(%arg0: i32) -> (i32, i32) {
    %c0_i32 = arith.constant 0 : i32
    %c0_i32_0 = arith.constant 0 : i32
    %c0_i32_1 = arith.constant 0 : i32
    return %c0_i32, %c0_i32_0 : i32, i32
  }
  func.func @transform_4(%arg0: i32) -> (i32, i32) {
    %c0_i32 = arith.constant 0 : i32
    %c0_i32_0 = arith.constant 0 : i32
    %c0_i32_1 = arith.constant 0 : i32
    return %c0_i32, %c0_i32_0 : i32, i32
  }
  func.func @transform_5(%arg0: i32) -> (i32, i32) {
    %c0_i32 = arith.constant 0 : i32
    %c0_i32_0 = arith.constant 0 : i32
    %c0_i32_1 = arith.constant 0 : i32
    return %c0_i32, %c0_i32_0 : i32, i32
  }
  func.func @transform_6(%arg0: i32) -> (i32, i32) {
    %c0_i32 = arith.constant 0 : i32
    %c0_i32_0 = arith.constant 0 : i32
    %c0_i32_1 = arith.constant 0 : i32
    return %c0_i32, %c0_i32_0 : i32, i32
  }
  func.func @transform_7(%arg0: i32) -> (i32, i32) {
    %c0_i32 = arith.constant 0 : i32
    %c0_i32_0 = arith.constant 0 : i32
    %c0_i32_1 = arith.constant 0 : i32
    return %c0_i32, %c0_i32_0 : i32, i32
  }
  func.func @transform_8(%arg0: i32) -> (i32, i32) {
    %c0_i32 = arith.constant 0 : i32
    %c0_i32_0 = arith.constant 0 : i32
    %c0_i32_1 = arith.constant 0 : i32
    return %c0_i32, %c0_i32_0 : i32, i32
  }
  func.func @transform_9(%arg0: i32) -> (i32, i32) {
    %c0_i32 = arith.constant 0 : i32
    %c0_i32_0 = arith.constant 0 : i32
    %c0_i32_1 = arith.constant 0 : i32
    return %c0_i32, %c0_i32_0 : i32, i32
  }
  func.func @transform_10(%arg0: i32) -> (i32, i32) {
    %c0_i32 = arith.constant 0 : i32
    %c0_i32_0 = arith.constant 0 : i32
    %c0_i32_1 = arith.constant 0 : i32
    return %c0_i32, %c0_i32_0 : i32, i32
  }
  func.func @transform_11(%arg0: i32) -> (i32, i32) {
    %c0_i32 = arith.constant 0 : i32
    %c0_i32_0 = arith.constant 0 : i32
    %c0_i32_1 = arith.constant 0 : i32
    return %c0_i32, %c0_i32_0 : i32, i32
  }
  func.func @transform_12(%arg0: i32) -> (i32, i32) {
    %c0_i32 = arith.constant 0 : i32
    %c0_i32_0 = arith.constant 0 : i32
    %c0_i32_1 = arith.constant 0 : i32
    return %c0_i32, %c0_i32_0 : i32, i32
  }
  func.func @transform_13(%arg0: i32) -> (i32, i32) {
    %c0_i32 = arith.constant 0 : i32
    %c0_i32_0 = arith.constant 0 : i32
    %c0_i32_1 = arith.constant 0 : i32
    return %c0_i32, %c0_i32_0 : i32, i32
  }
  func.func @transform_14(%arg0: i32) -> (i32, i32) {
    %c0_i32 = arith.constant 0 : i32
    %c0_i32_0 = arith.constant 0 : i32
    %c0_i32_1 = arith.constant 0 : i32
    return %c0_i32, %c0_i32_0 : i32, i32
  }
  func.func @transform_15(%arg0: i32) -> (i32, i32) {
    %c0_i32 = arith.constant 0 : i32
    %c0_i32_0 = arith.constant 0 : i32
    %c0_i32_1 = arith.constant 0 : i32
    return %c0_i32, %c0_i32_0 : i32, i32
  }
  func.func @transform_16(%arg0: i32) -> (i32, i32) {
    %c0_i32 = arith.constant 0 : i32
    %c0_i32_0 = arith.constant 0 : i32
    %c0_i32_1 = arith.constant 0 : i32
    return %c0_i32, %c0_i32_0 : i32, i32
  }
  func.func @transform_17(%arg0: i32) -> (i32, i32, i32) {
    %c0_i32 = arith.constant 0 : i32
    %c0_i32_0 = arith.constant 0 : i32
    %c0_i32_1 = arith.constant 0 : i32
    return %arg0, %c0_i32, %c0_i32_0 : i32, i32, i32
  }
  func.func @transform_18(%arg0: i32) -> (i32, i32, i32, i32) {
    %c0_i32 = arith.constant 0 : i32
    %c0_i32_0 = arith.constant 0 : i32
    %c0_i32_1 = arith.constant 0 : i32
    %c0_i32_2 = arith.constant 0 : i32
    return %arg0, %c0_i32, %c0_i32_0, %c0_i32_1 : i32, i32, i32, i32
  }
}

</mosaic_0001>

<bundles_post_ra>
// kernel: tpu_custom_call.1
= control target key start
LH: loop header
LB: loop body
LE: loop exit
PB: predicated region body
PF: predicated region fallthrough
CT: control target
= control target key end

     0   :  { %s1786_s30 = smov 0   ;;  %s2002_s0 = inlined_call_operand.<no memory space> [shape: f32[1], index: 0, kind: input, shape index: {}]   ;;  %s2003_s1 = inlined_call_operand.vmem [shape: bf16[2,16,8], index: 1, kind: input, shape index: {}]   ;;  %s2004_s2 = inlined_call_operand.vmem [shape: f32[8,8], index: 2, kind: input, shape index: {}]   ;;  %s2005_s3 = inlined_call_operand.vmem [shape: bf16[8,16], index: 3, kind: input, shape index: {}]   ;;  %s2006_s4 = inlined_call_operand.vmem [shape: f32[16,2], index: 4, kind: input, shape index: {}]   ;;  %s2007_s5 = inlined_call_operand.vmem [shape: f32[2,16], index: 5, kind: input, shape index: {}]   ;;  %s2008_s6 = inlined_call_operand.vmem [shape: f32[2,16], index: 6, kind: input, shape index: {}]   ;;  %s2009_s7 = inlined_call_operand.vmem [shape: f32[1,16], index: 7, kind: input, shape index: {}]   ;;  %s2010_s8 = inlined_call_operand.vmem [shape: bf16[16,16], index: 8, kind: input, shape index: {}]   ;;  %s2011_s9 = inlined_call_operand.vmem [shape: f32[16,2], index: 9, kind: input, shape index: {}]   ;;  %s2012_s10 = inlined_call_operand.vmem [shape: f32[2,16], index: 10, kind: input, shape index: {}]   ;;  %s2013_s11 = inlined_call_operand.vmem [shape: f32[2,16], index: 11, kind: input, shape index: {}]   ;;  %s2014_s12 = inlined_call_operand.vmem [shape: f32[1,16], index: 12, kind: input, shape index: {}]   ;;  %s2015_s13 = inlined_call_operand.vmem [shape: bf16[16,16], index: 13, kind: input, shape index: {}]   ;;  %s2016_s14 = inlined_call_operand.vmem [shape: f32[1,16], index: 14, kind: input, shape index: {}]   ;;  %s2017_s15 = inlined_call_operand.vmem [shape: bf16[16,4], index: 15, kind: input, shape index: {}]   ;;  %s2018_s16 = inlined_call_operand.vmem [shape: f32[1,4], index: 16, kind: input, shape index: {}]   ;;  %s2019_s17 = inlined_call_operand.vmem [shape: f32[2,2,2], index: 17, kind: input, shape index: {}]   ;;  %s2020_s18 = inlined_call_operand.vmem [shape: f32[2,2,3,4], index: 18, kind: output, shape index: {}]  }
   0x1   :  { %2021 = sst [smem:[#allocation3_spill]] %s2002_s0 }
   0x2   :  { %2022 = sst [smem:[#allocation4_spill]] %s2003_s1 }
   0x3   :  { %2023 = sst [smem:[#allocation5_spill]] %s2004_s2 }
   0x4   :  { %2024 = sst [smem:[#allocation6_spill]] %s2005_s3 }
   0x5   :  { %s2025_s29 = sld [smem:[#allocation3_spill]] }
   0xb   :  { %23 = sst [smem:[#allocation2]] %s2025_s29 }
   0xc LB: > { %s1524_s0 = sadd.s32 4294967295, %s1680_s30   ;;  %p1528_p0 = scmp.ge.s32.totalorder %s1680_s30, 1  ;;  %s1680_s30 = sphi %s1786_s30, %s29_s30  }
   0xd   : > { %p522_p1 = scmp.lt.s32.totalorder %s1680_s30, 3 }
   0xf   : > { %p523_p2 = pnand %p1528_p0, %p522_p1 }
  0x10   : > { %s2026_s3 = sld [smem:[#allocation6_spill]] (!%p523_p2)  ;;  %p580_p3 = scmp.lt.s32.totalorder (!%p523_p2), %s1524_s0, 1 }
  0x11   : > { %526 = sbr.rel (%p523_p2) target bundleno = 2330 (0x91a), region = 92  ;;  %s2027_s24 = sld [smem:[#allocation4_spill]] (!%p523_p2) }
  0x12   : > { %s2028_s20 = sld [smem:[#allocation5_spill]] (!%p523_p2)  ;;  %s1684_s21 = smov (!%p523_p2), 8  }
  0x13   : > { %s1685_s26 = smov (!%p523_p2), 120  }
  0x16   : > { %v598_v0 = vld [vmem:[%s2026_s3] sm:$0xf]  ;;  %vm608_vm0 = vcmask 1043456   ;;  %v627_v1 = vld [vmem:[%s2006_s4 + $0x8] sm:$0xff]  ;;  %s2030_s0 = smov (!%p580_p3, %s1524_s0), 1  ;;  %vm604_vm1 = vcmask 64512  }
  0x17   : > { %v610_v2 = vsel %vm608_vm0, %v598_v0, 0  ;;  %649 = vmatpush.msra.mxu1 %v627_v1  ;;  %s1575_s22 = sshll.u32 %s2030_s0, 3  ;;  %v626_v4 = vld [vmem:[%s2006_s4] sm:$0xff]  ;;  %vm628_vm2 = vcmask 130048   ;;  %v1682_v12 = vmov 0   ;;  %v1683_v15 = vmov 1  }
  0x18   : > { %619 = vmatpush.bf16.msra.mxu0 %v610_v2  ;;  %s584_s25 = scalar_lea.vmem %s2027_s24, %s1575_s22  ;;  %v658_v11 = vld [vmem:[%s2007_s5] sm:$0x3]  ;;  %1623 = vset.pattern.permute.xlu2 %v1682_v12  ;;  %vm807_vm3 = vcmask 122944   ;;  %vm685_vm4 = vcmask 57344   ;;  %vm879_vm5 = vcmask 123969   ;;  %vm748_vm6 = vcmask 58369  }
  0x19   : > { %v1577_v3 = vld [vmem:[%s584_s25] sm:$0xff]  ;;  %650 = vmatpush.msra.mxu1 %v626_v4  ;;  %1628 = vset.pattern.permute.xlu0 %v1682_v12 }
  0x1a   : > { %1625 = vset.pattern.permute.xlu1 %v1682_v12  ;;  %v1846_v21 = vld [vmem:[%s2028_s20] sm:$0xff] }
  0x1b   : > { %1538 = vmatmul.msk.bf16.vlgmr.msra.gmra.mxu0 %vm604_vm1, %v1577_v3 }
  0x98   : > { %v621_v5 = vpop.f32.mrf.mxu0 }
  0x99   : > { %1539 = vmatmul.msk.f32.vlgmr.msra.gmra.mxu1 %vm628_vm2, %v621_v5  ;;  %v683_v6 = vpack.c.bf16 %v621_v5, %v621_v5 }
  0x9b   : > { %v728_v7 = vsel %vm608_vm0, %v683_v6, 0 }
  0x9c   : > { %737 = vmatpush.bf16.msra.mxu3 %v728_v7 }
  0xa0   : > { %v623_v8 = vpop.f32.mrf.mxu0 }
  0xa1   : > { %1540 = vmatmul.msk.f32.gmra.mxu1 %vm628_vm2, %v623_v8  ;;  %1541 = vmatpush.xpose.msk.msra.mxu2 %vm628_vm2, %v623_v8  ;;  %v684_v9 = vpack.c.bf16 %v623_v8, %v623_v8 }
  0xa3   : > { %v860_v10 = vsel %vm608_vm0, %v684_v9, 0 }
  0xa4   : > { %869 = vmatpush.bf16.msrb.mxu0 %v860_v10  ;;  %933 = vmatpush.bf16.msrb.mxu1 %v860_v10 }
  0xa5   : > { %1542 = vmatpush.xpose.msk.msra.mxu2 %vm628_vm2, %v621_v5 }
  0xa8   : > { %1543 = vmatmul.msk.f32.vlgmr.msra.gmra.mxu2 %vm628_vm2, %v658_v11 }
  0xa9   : > { %796 = vmatpush.bf16.msrb.mxu2 %v728_v7 }
 0x116   : > { %v1826_v13 = vpop.f32.mrf.mxu1 }
 0x11e   : > { %v1828_v14 = vpop.f32.mrf.mxu1 }
 0x11f   : > { %825 = vperm.xlu2 %1623, %v1828_v14  }
 0x127   : > { %1624 = vset.pattern.permute.xlu2 %v1683_v15 }
 0x128   : > { %896 = vperm.xlu2 %1624, %v1828_v14  }
 0x12b   : > { %v1833_v16 = vpop.f32.mrf.mxu2 }
 0x12c   : > { %v808_v17 = vsel %vm807_vm3, %v1833_v16, -inf  ;;  %v686_v18 = vsel %vm685_vm4, %v1833_v16, -inf  ;;  %v880_v19 = vsel %vm879_vm5, %v1833_v16, -inf  ;;  %v749_v20 = vsel %vm748_vm6, %v1833_v16, -inf }
 0x12d   : > { %809 = vmax.xlane.f32.xlu1 %v808_v17  ;;  %687 = vmax.xlane.f32.xlu0 %v686_v18  ;;  %v768_v4 = vperm.slane %v1833_v16, 1 }
 0x135   : > { %881 = vmax.xlane.f32.xlu1 %v880_v19  ;;  %750 = vmax.xlane.f32.xlu0 %v749_v20 }
 0x149   : > { %833 = vrot.lane.b32.xlu0 %v1846_v21, %s1684_s21 }
 0x179   : > { %v826_v2 = vpop.permute.xlu2 %825 }
 0x182   : > { %v897_v3 = vpop.permute.xlu2 %896 }
 0x183   : > { %v899_v5 = vadd.f32 %v897_v3, %v768_v4 }
 0x185   : > { %v901_v6 = vmul.f32 0.2, %v899_v5  ;;  %vm900_vm11 = vcmp.gt.f32.partialorder %v899_v5, 0.0 }
 0x187   : > { %v902_v8 = vsel %vm900_vm11, %v899_v5, %v901_v6 }
 0x1a0   : > { %v810_v22 = vpop.xlane.xlu1 %809  ;;  %v688_v23 = vpop.xlane.xlu0 %687 }
 0x1a1   : > { %v811_v24 = vrot.slane %v810_v22, 4  ;;  %v689_v25 = vrot.slane %v688_v23, 4 }
 0x1a3   : > { %v690_v26 = vmax.f32 %v688_v23, %v689_v25  ;;  %v812_v27 = vmax.f32 %v810_v22, %v811_v24 }
 0x1a5   : > { %v691_v28 = vrot.slane %v690_v26, 2  ;;  %v813_v30 = vrot.slane %v812_v27, 2 }
 0x1a7   : > { %v692_v29 = vmax.f32 %v690_v26, %v691_v28  ;;  %v814_v39 = vmax.f32 %v812_v27, %v813_v30 }
 0x1a8   : > { %v882_v31 = vpop.xlane.xlu1 %881  ;;  %v751_v32 = vpop.xlane.xlu0 %750 }
 0x1a9   : > { %v883_v33 = vrot.slane %v882_v31, 4  ;;  %v752_v34 = vrot.slane %v751_v32, 4  ;;  %v693_v35 = vrot.slane %v692_v29, 1  ;;  %v815_v44 = vrot.slane %v814_v39, 1 }
 0x1ab   : > { %v884_v36 = vmax.f32 %v882_v31, %v883_v33  ;;  %v753_v37 = vmax.f32 %v751_v32, %v752_v34  ;;  %v694_v38 = vmax.f32 %v692_v29, %v693_v35  ;;  %v816_v49 = vmax.f32 %v814_v39, %v815_v44 }
 0x1ad   : > { %v885_v40 = vrot.slane %v884_v36, 2  ;;  %v754_v41 = vrot.slane %v753_v37, 2  ;;  %1581 = vpush %v694_v38 }
 0x1af   : > { %v755_v42 = vmax.f32 %v753_v37, %v754_v41  ;;  %v886_v43 = vmax.f32 %v884_v36, %v885_v40 }
 0x1b1   : > { %v756_v45 = vrot.slane %v755_v42, 1  ;;  %v887_v46 = vrot.slane %v886_v43, 1 }
 0x1b3   : > { %v757_v47 = vmax.f32 %v755_v42, %v756_v45  ;;  %v888_v48 = vmax.f32 %v886_v43, %v887_v46 }
 0x1b5   : > { %1583 = vpush %v757_v47 }
 0x1b6   : > { %1585 = vpush %v816_v49 }
 0x1b7   : > { %1587 = vpush %v888_v48 }
 0x1bb   : > { %v1861_v7 = vpop.permute.xlu0 %833 }
 0x1bc   : > { %v903_v9 = vadd.f32 %v902_v8, %v1861_v7 }
 0x1de   : > { %s1582_s2 = spop %1581 }
 0x1df   : > { %v696_v50 = vstv %s1582_s2  ;;  %s1687_s2 = smov 1.0  }
 0x1e0   : > { %v697_v51 = vadd.f32 %v696_v50, %v1826_v13 }
 0x1e2   : > { %v699_v52 = vmul.f32 0.2, %v697_v51  ;;  %vm698_vm7 = vcmp.gt.f32.partialorder %v697_v51, 0.0 }
 0x1e4   : > { %v700_v53 = vsel %vm698_vm7, %v697_v51, %v699_v52 }
 0x1e5   : > { %714 = vperm.xlu0 %1628, %v700_v53  }
 0x1e6   : > { %s1584_s23 = spop %1583 }
 0x1e7   : > { %s1586_s24 = spop %1585  ;;  %v759_v62 = vstv %s1584_s23 }
 0x1e8   : > { %v818_v54 = vstv %s1586_s24  ;;  %s1588_s25 = spop %1587  ;;  %v760_v63 = vadd.f32 %v759_v62, %v1826_v13 }
 0x1e9   : > { %v819_v55 = vadd.f32 %v818_v54, %v1828_v14  ;;  %v890_v56 = vstv %s1588_s25  ;;  %s1980_s25 = sld [smem:[#allocation2]] }
 0x1ea   : > { %v891_v57 = vadd.f32 %v890_v56, %v1828_v14  ;;  %v762_v0 = vmul.f32 0.2, %v760_v63  ;;  %vm761_vm10 = vcmp.gt.f32.partialorder %v760_v63, 0.0  ;;  %v706_v14 = vperm.slane %v1833_v16, 0 }
 0x1eb   : > { %v821_v58 = vmul.f32 0.2, %v819_v55  ;;  %vm820_vm8 = vcmp.gt.f32.partialorder %v819_v55, 0.0 }
 0x1ec   : > { %v893_v59 = vmul.f32 0.2, %v891_v57  ;;  %vm892_vm9 = vcmp.gt.f32.partialorder %v891_v57, 0.0  ;;  %v763_v1 = vsel %vm761_vm10, %v760_v63, %v762_v0  ;;  %v828_v23 = vadd.f32 %v826_v2, %v706_v14 }
 0x1ed   : > { %v822_v60 = vsel %vm820_vm8, %v819_v55, %v821_v58  ;;  %1629 = vset.pattern.permute.xlu0 %v1683_v15 }
 0x1ee   : > { %v894_v61 = vsel %vm892_vm9, %v891_v57, %v893_v59  ;;  %839 = vperm.xlu1 %1625, %v822_v60   ;;  %v830_v27 = vmul.f32 0.2, %v828_v23  ;;  %vm829_vm13 = vcmp.gt.f32.partialorder %v828_v23, 0.0  ;;  %vm1359_vm9 = vcmask 26624  }
 0x1ef   : > { %906 = vperm.xlu2 %1624, %v894_v61   ;;  %v682_v61 = vld [vmem:[%s2008_s6] sm:$0x3] }
 0x1f0   : > { %v831_v32 = vsel %vm829_vm13, %v828_v23, %v830_v27  ;;  %v744_v63 = vperm.slane %v682_v61, 0 }
 0x1f1   : > { %v836_v33 = vadd.f32 %v1861_v7, %v831_v32 }
 0x1f6   : > { %1631 = vset.pattern.permute.xlu1 %v1683_v15 }
 0x1f7   : > { %1626 = vset.pattern.permute.xlu2 %v1682_v12 }
 0x1f8   : > { %703 = vperm.xlu2 %1626, %v1826_v13  }
 0x200   : > { %1627 = vset.pattern.permute.xlu2 %v1683_v15 }
 0x201   : > { %765 = vperm.xlu2 %1627, %v1826_v13  }
 0x209   : > { %776 = vperm.xlu2 %1627, %v763_v1   ;;  %v803_v1 = vperm.slane %v682_v61, 1 }
 0x211   : > { %1630 = vset.pattern.permute.xlu2 %v1682_v12 }
 0x249   : > { %v907_v10 = vpop.permute.xlu2 %906 }
 0x24a   : > { %v909_v11 = vsub.f32 %v903_v9, %v907_v10 }
 0x24c   : > { %v910_v13 = vmul.f32 1.442695, %v909_v11  ;;  %v1578_v11 = vld [vmem:[%s2010_s8] sm:$0xff] }
 0x24d   : > { %970 = vmatpush.bf16.msrb.mxu3 %v1578_v11 }
 0x24e   : > { %1638 = vpow2.f32 %v910_v13  ;;  %v978_v13 = vld [vmem:[%s2011_s9 + $0x8] sm:$0xff] }
 0x24f   : > { %999 = vmatpush.msra.mxu2 %v978_v13 }
 0x252   : > { %v704_v17 = vpop.permute.xlu2 %703 }
 0x253   : > { %v707_v18 = vadd.f32 %v706_v14, %v704_v17 }
 0x254   : > { %v1639_v19 = vpop.eup %1638 }
 0x255   : > { %vm708_vm12 = vcmp.gt.f32.partialorder %v707_v18, 0.0  ;;  %v709_v20 = vmul.f32 0.2, %v707_v18  ;;  %913 = vrot.lane.b32.xlu0 %v1639_v19, %s1685_s26  ;;  %v919_v22 = vpack.c.bf16 %v1639_v19, %v1639_v19 }
 0x257   : > { %921 = vrot.lane.b32.xlu2 %v919_v22, %s1685_s26  ;;  %v715_v24 = vpop.permute.xlu0 %714  ;;  %v710_v25 = vsel %vm708_vm12, %v707_v18, %v709_v20 }
 0x258   : > { %v711_v26 = vadd.f32 %v710_v25, %v1846_v21 }
 0x25a   : > { %v717_v28 = vsub.f32 %v711_v26, %v715_v24  ;;  %v1634_v24 = vld [vmem:[%s2009_s7] ss:$0 sm:$0xff] }
 0x25b   : > { %v766_v16 = vpop.permute.xlu2 %765 }
 0x25c   : > { %v718_v29 = vmul.f32 1.442695, %v717_v28  ;;  %v769_v30 = vadd.f32 %v768_v4, %v766_v16 }
 0x25e   : > { %1640 = vpow2.f32 %v718_v29  ;;  %vm770_vm14 = vcmp.gt.f32.partialorder %v769_v30, 0.0  ;;  %v771_v31 = vmul.f32 0.2, %v769_v30 }
 0x260   : > { %v840_v34 = vpop.permute.xlu1 %839  ;;  %v772_v35 = vsel %vm770_vm14, %v769_v30, %v771_v31 }
 0x261   : > { %v842_v36 = vsub.f32 %v836_v33, %v840_v34  ;;  %v773_v37 = vadd.f32 %v772_v35, %v1846_v21  ;;  %v977_v33 = vld [vmem:[%s2011_s9] sm:$0xff] }
 0x262   : > { %1000 = vmatpush.msra.mxu2 %v977_v33 }
 0x263   : > { %v843_v38 = vmul.f32 1.442695, %v842_v36  ;;  %v777_v39 = vpop.permute.xlu2 %776 }
 0x264   : > { %v1641_v40 = vpop.eup %1640  ;;  %v779_v41 = vsub.f32 %v773_v37, %v777_v39 }
 0x265   : > { %1642 = vpow2.f32 %v843_v38  ;;  %v723_v42 = vpack.c.bf16 %v1641_v40, %v1641_v40  ;;  %v720_v48 = vsel %vm604_vm1, %v1641_v40, 0.0  ;;  %v1008_v40 = vld [vmem:[%s2012_s10] sm:$0x3] }
 0x266   : > { %v780_v43 = vmul.f32 1.442695, %v779_v41 }
 0x267   : > { %1544 = vmatmul.msk.bf16.vlgmr.msra.gmra.mxu3 %vm604_vm1, %v723_v42 }
 0x268   : > { %1644 = vpow2.f32 %v780_v43 }
 0x26b   : > { %v1643_v44 = vpop.eup %1642 }
 0x26c   : > { %v852_v45 = vpack.c.bf16 %v1643_v44, %v1643_v44 }
 0x26e   : > { %v1645_v46 = vpop.eup %1644  ;;  %854 = vrot.lane.b32.xlu1 %v852_v45, %s1685_s26 }
 0x26f   : > { %v785_v47 = vpack.c.bf16 %v1645_v46, %v1645_v46  ;;  %v782_v49 = vsel %vm604_vm1, %v1645_v46, 0.0 }
 0x271   : > { %1545 = vmatmul.msk.bf16.vlgmr.msrb.gmra.mxu2 %vm604_vm1, %v785_v47 }
 0x276   : > { %846 = vrot.lane.b32.xlu1 %v1643_v44, %s1685_s26 }
 0x280   : > { %721 = vadd.xlane.f32.xlu2 %v720_v48 }
 0x2a0   : > { %783 = vadd.xlane.f32.xlu1 %v782_v49 }
 0x2b1   : > { %v922_v50 = vpop.permute.xlu2 %921 }
 0x2b2   : > { %1547 = vmatmul.msk.bf16.vlgmr.msrb.gmra.mxu1 %vm604_vm1, %v922_v50 }
 0x2c7   : > { %v914_v51 = vpop.permute.xlu0 %913 }
 0x2c8   : > { %v916_v52 = vsel %vm604_vm1, %v914_v51, 0.0 }
 0x2c9   : > { %917 = vadd.xlane.f32.xlu2 %v916_v52 }
 0x2e0   : > { %v855_v53 = vpop.permute.xlu1 %854 }
 0x2e1   : > { %1546 = vmatmul.msk.bf16.vlgmr.msrb.gmra.mxu0 %vm604_vm1, %v855_v53 }
 0x2e8   : > { %v847_v54 = vpop.permute.xlu1 %846 }
 0x2e9   : > { %v849_v55 = vsel %vm604_vm1, %v847_v54, 0.0 }
 0x2ea   : > { %v739_v56 = vpop.f32.mrf.mxu3  ;;  %850 = vadd.xlane.f32.xlu0 %v849_v55 }
 0x2f2   : > { %v741_v57 = vpop.f32.mrf.mxu3 }
 0x2f3   : > { %v722_v60 = vpop.xlane.xlu2 %721 }
 0x2f4   : > { %v798_v58 = vpop.f32.mrf.mxu2  ;;  %1646 = vrcp.f32 %v722_v60 }
 0x2fa   : > { %v1647_v0 = vpop.eup %1646 }
 0x2fb   : > { %v745_v2 = vmul.f32 %v1647_v0, %v744_v63 }
 0x2fc   : > { %v800_v59 = vpop.f32.mrf.mxu2 }
 0x2fd   : > { %v746_v5 = vmul.f32 %v745_v2, %v739_v56 }
 0x313   : > { %v784_v62 = vpop.xlane.xlu1 %783 }
 0x314   : > { %1648 = vrcp.f32 %v784_v62 }
 0x31a   : > { %v1649_v3 = vpop.eup %1648 }
 0x31b   : > { %v804_v4 = vmul.f32 %v1649_v3, %v803_v1 }
 0x31d   : > { %v805_v6 = vmul.f32 %v804_v4, %v798_v58 }
 0x31f   : > { %v806_v8 = vadd.f32 %v805_v6, %v746_v5 }
 0x321   : > { %v947_v16 = vadd.f32 %v1634_v24, %v806_v8 }
 0x323   : > { %v949_v30 = vmax.f32 %v947_v16, 0.0 }
 0x32f   : > { %v935_v9 = vpop.f32.mrf.mxu1 }
 0x337   : > { %v937_v10 = vpop.f32.mrf.mxu1 }
 0x33c   : > { %v918_v14 = vpop.xlane.xlu2 %917 }
 0x33d   : > { %1650 = vrcp.f32 %v918_v14 }
 0x343   : > { %v1651_v19 = vpop.eup %1650 }
 0x344   : > { %v940_v20 = vmul.f32 %v1651_v19, %v803_v1 }
 0x346   : > { %v941_v27 = vmul.f32 %v940_v20, %v935_v9 }
 0x35d   : > { %v851_v17 = vpop.xlane.xlu0 %850 }
 0x35e   : > { %1652 = vrcp.f32 %v851_v17  ;;  %v871_v18 = vpop.f32.mrf.mxu0 }
 0x364   : > { %v1653_v22 = vpop.eup %1652 }
 0x365   : > { %v876_v23 = vmul.f32 %v1653_v22, %v744_v63 }
 0x366   : > { %v873_v25 = vpop.f32.mrf.mxu0 }
 0x367   : > { %v877_v26 = vmul.f32 %v876_v23, %v871_v18 }
 0x369   : > { %v942_v28 = vadd.f32 %v941_v27, %v877_v26 }
 0x36b   : > { %v948_v29 = vadd.f32 %v1634_v24, %v942_v28 }
 0x36d   : > { %v950_v31 = vmax.f32 %v948_v29, 0.0 }
 0x36f   : > { %v951_v32 = vpack.c.bf16 %v950_v31, %v949_v30 }
 0x371   : > { %1552 = vmatmul.msk.bf16.vlgmr.msrb.gmra.mxu3 %vm628_vm2, %v951_v32 }
 0x3f4   : > { %v972_v34 = vpop.f32.mrf.mxu3 }
 0x3f5   : > { %v1033_v35 = vpack.c.bf16 %v972_v34, %v972_v34  ;;  %1553 = vmatmul.msk.f32.vlgmr.msra.gmra.mxu2 %vm628_vm2, %v972_v34 }
 0x3f7   : > { %v1077_v36 = vsel %vm608_vm0, %v1033_v35, 0 }
 0x3f8   : > { %1086 = vmatpush.bf16.msra.mxu1 %v1077_v36  ;;  %1144 = vmatpush.bf16.msra.mxu3 %v1077_v36 }
 0x3fc   : > { %v974_v37 = vpop.f32.mrf.mxu3 }
 0x3fd   : > { %v1034_v38 = vpack.c.bf16 %v974_v37, %v974_v37  ;;  %1554 = vmatmul.msk.f32.gmra.mxu2 %vm628_vm2, %v974_v37  ;;  %1555 = vmatpush.xpose.msk.msra.mxu0 %vm628_vm2, %v974_v37 }
 0x3ff   : > { %v1203_v39 = vsel %vm608_vm0, %v1034_v38, 0 }
 0x400   : > { %1275 = vmatpush.bf16.msrb.mxu2 %v1203_v39 }
 0x401   : > { %1556 = vmatpush.xpose.msk.msra.mxu0 %vm628_vm2, %v972_v34 }
 0x404   : > { %1557 = vmatmul.msk.f32.vlgmr.msra.gmra.mxu0 %vm628_vm2, %v1008_v40 }
 0x405   : > { %1212 = vmatpush.bf16.msrb.mxu0 %v1203_v39 }
 0x478   : > { %v1916_v46 = vpop.f32.mrf.mxu2 }
 0x480   : > { %v1005_v47 = vpop.f32.mrf.mxu2 }
 0x481   : > { %v1906_v41 = vpop.f32.mrf.mxu0 }
 0x482   : > { %v1155_v42 = vsel %vm807_vm3, %v1906_v41, -inf  ;;  %v1097_v43 = vsel %vm748_vm6, %v1906_v41, -inf  ;;  %v1035_v44 = vsel %vm685_vm4, %v1906_v41, -inf  ;;  %v1222_v45 = vsel %vm879_vm5, %v1906_v41, -inf }
 0x483   : > { %1156 = vmax.xlane.f32.xlu2 %v1155_v42  ;;  %1098 = vmax.xlane.f32.xlu0 %v1097_v43  ;;  %v1055_v32 = vperm.slane %v1906_v41, 0 }
 0x484   : > { %1036 = vmax.xlane.f32.xlu1 %v1035_v44 }
 0x48c   : > { %1223 = vmax.xlane.f32.xlu1 %v1222_v45 }
 0x497   : > { %1238 = vperm.xlu0 %1629, %v1005_v47  }
 0x49b   : > { %1172 = vperm.xlu2 %1630, %v1005_v47  }
 0x49f   : > { %1632 = vset.pattern.permute.xlu0 %v1682_v12 }
 0x4f6   : > { %v1157_v48 = vpop.xlane.xlu2 %1156  ;;  %v1099_v49 = vpop.xlane.xlu0 %1098 }
 0x4f7   : > { %v1158_v50 = vrot.slane %v1157_v48, 4  ;;  %v1100_v51 = vrot.slane %v1099_v49, 4  ;;  %v1037_v52 = vpop.xlane.xlu1 %1036 }
 0x4f8   : > { %v1038_v53 = vrot.slane %v1037_v52, 4 }
 0x4f9   : > { %v1159_v54 = vmax.f32 %v1157_v48, %v1158_v50  ;;  %v1101_v55 = vmax.f32 %v1099_v49, %v1100_v51 }
 0x4fa   : > { %v1039_v56 = vmax.f32 %v1037_v52, %v1038_v53 }
 0x4fb   : > { %v1160_v57 = vrot.slane %v1159_v54, 2  ;;  %v1102_v58 = vrot.slane %v1101_v55, 2 }
 0x4fc   : > { %v1040_v59 = vrot.slane %v1039_v56, 2 }
 0x4fd   : > { %v1103_v60 = vmax.f32 %v1101_v55, %v1102_v58  ;;  %v1161_v61 = vmax.f32 %v1159_v54, %v1160_v57 }
 0x4fe   : > { %v1041_v62 = vmax.f32 %v1039_v56, %v1040_v59  ;;  %v1173_v31 = vpop.permute.xlu2 %1172 }
 0x4ff   : > { %v1224_v63 = vpop.xlane.xlu1 %1223  ;;  %v1104_v0 = vrot.slane %v1103_v60, 1  ;;  %v1162_v1 = vrot.slane %v1161_v61, 1  ;;  %v1175_v33 = vadd.f32 %v1173_v31, %v1055_v32 }
 0x500   : > { %v1225_v2 = vrot.slane %v1224_v63, 4  ;;  %v1042_v12 = vrot.slane %v1041_v62, 1 }
 0x501   : > { %v1105_v3 = vmax.f32 %v1103_v60, %v1104_v0  ;;  %v1163_v6 = vmax.f32 %v1161_v61, %v1162_v1  ;;  %v1177_v34 = vmul.f32 0.2, %v1175_v33  ;;  %vm1176_vm5 = vcmp.gt.f32.partialorder %v1175_v33, 0.0 }
 0x502   : > { %v1226_v4 = vmax.f32 %v1224_v63, %v1225_v2  ;;  %v1043_v5 = vmax.f32 %v1041_v62, %v1042_v12 }
 0x503   : > { %v1178_v35 = vsel %vm1176_vm5, %v1175_v33, %v1177_v34  ;;  %v1579_v34 = vld [vmem:[%s2015_s13] sm:$0xff] }
 0x504   : > { %v1227_v8 = vrot.slane %v1226_v4, 2  ;;  %1589 = vpush %v1043_v5  ;;  %1316 = vmatpush.bf16.msrb.mxu1 %v1579_v34 }
 0x505   : > { %1591 = vpush %v1105_v3 }
 0x506   : > { %1593 = vpush %v1163_v6  ;;  %v1228_v9 = vmax.f32 %v1226_v4, %v1227_v8 }
 0x508   : > { %v1229_v10 = vrot.slane %v1228_v9, 1 }
 0x509   : > { %v1239_v44 = vpop.permute.xlu0 %1238 }
 0x50a   : > { %v1230_v11 = vmax.f32 %v1228_v9, %v1229_v10 }
 0x50c   : > { %1595 = vpush %v1230_v11 }
 0x535   : > { %s1590_s28 = spop %1589 }
 0x536   : > { %v1045_v13 = vstv %s1590_s28  ;;  %s1592_s29 = spop %1591 }
 0x537   : > { %v1046_v14 = vadd.f32 %v1045_v13, %v1916_v46  ;;  %s1594_s19 = spop %1593  ;;  %v1107_v28 = vstv %s1592_s29  ;;  %s1686_s29 = smov 0.0  }
 0x538   : > { %v1165_v17 = vstv %s1594_s19  ;;  %v1108_v16 = vadd.f32 %v1107_v28, %v1916_v46  ;;  %s1531_s19 = sshll.u32 %s2030_s0, 1 }
 0x539   : > { %v1048_v18 = vmul.f32 0.2, %v1046_v14  ;;  %v1166_v19 = vadd.f32 %v1165_v17, %v1005_v47  ;;  %vm1047_vm15 = vcmp.gt.f32.partialorder %v1046_v14, 0.0  ;;  %s588_s20 = scalar_lea.vmem %s2019_s17, %s1531_s19 }
 0x53a   : > { %v1110_v29 = vmul.f32 0.2, %v1108_v16  ;;  %vm1109_vm4 = vcmp.gt.f32.partialorder %v1108_v16, 0.0 }
 0x53b   : > { %v1168_v20 = vmul.f32 0.2, %v1166_v19  ;;  %v1049_v22 = vsel %vm1047_vm15, %v1046_v14, %v1048_v18  ;;  %vm1167_vm0 = vcmp.gt.f32.partialorder %v1166_v19, 0.0 }
 0x53c   : > { %1063 = vperm.xlu0 %1632, %v1049_v22   ;;  %v1111_v30 = vsel %vm1109_vm4, %v1108_v16, %v1110_v29 }
 0x53d   : > { %v1169_v23 = vsel %vm1167_vm0, %v1166_v19, %v1168_v20  ;;  %s1596_s1 = spop %1595 }
 0x53e   : > { %1182 = vperm.xlu2 %1630, %v1169_v23   ;;  %v1232_v24 = vstv %s1596_s1 }
 0x53f   : > { %v1233_v25 = vadd.f32 %v1232_v24, %v1005_v47  ;;  %v1032_v24 = vld [vmem:[%s2013_s11] sm:$0x3] }
 0x541   : > { %v1235_v26 = vmul.f32 0.2, %v1233_v25  ;;  %vm1234_vm3 = vcmp.gt.f32.partialorder %v1233_v25, 0.0 }
 0x543   : > { %v1236_v27 = vsel %vm1234_vm3, %v1233_v25, %v1235_v26  ;;  %v1093_v25 = vperm.slane %v1032_v24, 0  ;;  %v1151_v26 = vperm.slane %v1032_v24, 1 }
 0x544   : > { %1248 = vperm.xlu1 %1631, %v1236_v27   ;;  %1633 = vset.pattern.permute.xlu0 %v1683_v15  ;;  %v1179_v15 = vadd.f32 %v1178_v35, %v1861_v7 }
 0x546   : > { %1052 = vperm.xlu2 %1630, %v1916_v46  }
 0x54c   : > { %1113 = vperm.xlu1 %1631, %v1916_v46   ;;  %v1116_v46 = vperm.slane %v1906_v41, 1 }
 0x54e   : > { %v1241_v47 = vadd.f32 %v1239_v44, %v1116_v46 }
 0x550   : > { %v1243_v50 = vmul.f32 0.2, %v1241_v47  ;;  %vm1242_vm7 = vcmp.gt.f32.partialorder %v1241_v47, 0.0 }
 0x552   : > { %v1244_v54 = vsel %vm1242_vm7, %v1241_v47, %v1243_v50 }
 0x553   : > { %v1245_v55 = vadd.f32 %v1244_v54, %v1861_v7 }
 0x554   : > { %1124 = vperm.xlu1 %1631, %v1111_v30  }
 0x598   : > { %v1183_v36 = vpop.permute.xlu2 %1182 }
 0x599   : > { %v1185_v37 = vsub.f32 %v1179_v15, %v1183_v36 }
 0x59b   : > { %v1186_v38 = vmul.f32 1.442695, %v1185_v37 }
 0x59d   : > { %1654 = vpow2.f32 %v1186_v38 }
 0x5a0   : > { %v1053_v39 = vpop.permute.xlu2 %1052 }
 0x5a1   : > { %v1056_v40 = vadd.f32 %v1055_v32, %v1053_v39 }
 0x5a3   : > { %v1655_v42 = vpop.eup %1654  ;;  %v1058_v45 = vmul.f32 0.2, %v1056_v40  ;;  %vm1057_vm6 = vcmp.gt.f32.partialorder %v1056_v40, 0.0 }
 0x5a4   : > { %v1195_v43 = vpack.c.bf16 %v1655_v42, %v1655_v42 }
 0x5a5   : > { %v1059_v48 = vsel %vm1057_vm6, %v1056_v40, %v1058_v45 }
 0x5a6   : > { %1197 = vrot.lane.b32.xlu1 %v1195_v43, %s1685_s26  ;;  %v1060_v49 = vadd.f32 %v1059_v48, %v1846_v21  ;;  %v1635_v43 = vld [vmem:[%s2014_s12] ss:$0 sm:$0xff] }
 0x5ae   : > { %v1064_v51 = vpop.permute.xlu0 %1063 }
 0x5af   : > { %v1066_v52 = vsub.f32 %v1060_v49, %v1064_v51 }
 0x5b1   : > { %v1067_v53 = vmul.f32 1.442695, %v1066_v52 }
 0x5b3   : > { %1656 = vpow2.f32 %v1067_v53  ;;  %v1580_v53 = vld [vmem:[%s2017_s15] sm:$0xff] }
 0x5b4   : > { %1348 = vmatpush.bf16.msrb.mxu3 %v1580_v53 }
 0x5b6   : > { %v1249_v56 = vpop.permute.xlu1 %1248 }
 0x5b7   : > { %v1251_v57 = vsub.f32 %v1245_v55, %v1249_v56  ;;  %v1636_v55 = vld [vmem:[%s2016_s14] ss:$0 sm:$0xff] }
 0x5b9   : > { %v1657_v58 = vpop.eup %1656  ;;  %v1252_v59 = vmul.f32 1.442695, %v1251_v57 }
 0x5ba   : > { %v1072_v60 = vpack.c.bf16 %v1657_v58, %v1657_v58  ;;  %v1069_v41 = vsel %vm604_vm1, %v1657_v58, 0.0 }
 0x5bb   : > { %1658 = vpow2.f32 %v1252_v59  ;;  %1070 = vadd.xlane.f32.xlu0 %v1069_v41 }
 0x5bc   : > { %1558 = vmatmul.msk.bf16.vlgmr.msra.gmra.mxu1 %vm604_vm1, %v1072_v60 }
 0x5be   : > { %v1114_v61 = vpop.permute.xlu1 %1113 }
 0x5bf   : > { %v1117_v62 = vadd.f32 %v1116_v46, %v1114_v61  ;;  %v1357_v61 = vld [vmem:[%s588_s20] sm:$0x3] }
 0x5c1   : > { %v1659_v63 = vpop.eup %1658  ;;  %vm1118_vm8 = vcmp.gt.f32.partialorder %v1117_v62, 0.0  ;;  %v1119_v0 = vmul.f32 0.2, %v1117_v62 }
 0x5c2   : > { %1255 = vrot.lane.b32.xlu1 %v1659_v63, %s1685_s26  ;;  %v1261_v1 = vpack.c.bf16 %v1659_v63, %v1659_v63  ;;  %v1637_v63 = vld [vmem:[%s2018_s16] ss:$0 sm:$0xff] }
 0x5c3   : > { %v1120_v7 = vsel %vm1118_vm8, %v1117_v62, %v1119_v0 }
 0x5c4   : > { %1263 = vrot.lane.b32.xlu2 %v1261_v1, %s1685_s26  ;;  %v1121_v2 = vadd.f32 %v1120_v7, %v1846_v21 }
 0x5c6   : > { %v1125_v12 = vpop.permute.xlu1 %1124 }
 0x5c7   : > { %v1127_v3 = vsub.f32 %v1121_v2, %v1125_v12 }
 0x5c9   : > { %v1128_v4 = vmul.f32 1.442695, %v1127_v3 }
 0x5cb   : > { %1660 = vpow2.f32 %v1128_v4 }
 0x5cc   : > { %1189 = vrot.lane.b32.xlu2 %v1655_v42, %s1685_s26 }
 0x5d1   : > { %v1661_v5 = vpop.eup %1660 }
 0x5d2   : > { %v1133_v6 = vpack.c.bf16 %v1661_v5, %v1661_v5  ;;  %v1130_v8 = vsel %vm604_vm1, %v1661_v5, 0.0 }
 0x5d4   : > { %1559 = vmatmul.msk.bf16.vlgmr.msra.gmra.mxu3 %vm604_vm1, %v1133_v6  ;;  %v1418_v6 = vrot.slane %v1357_v61, 1 }
 0x5f5   : > { %1131 = vadd.xlane.f32.xlu2 %v1130_v8 }
 0x618   : > { %v1198_v9 = vpop.permute.xlu1 %1197 }
 0x619   : > { %1560 = vmatmul.msk.bf16.vlgmr.msrb.gmra.mxu0 %vm604_vm1, %v1198_v9 }
 0x61e   : > { %v1264_v10 = vpop.permute.xlu2 %1263 }
 0x61f   : > { %1561 = vmatmul.msk.bf16.vlgmr.msrb.gmra.mxu2 %vm604_vm1, %v1264_v10 }
 0x626   : > { %v1190_v21 = vpop.permute.xlu2 %1189 }
 0x627   : > { %v1192_v11 = vsel %vm604_vm1, %v1190_v21, 0.0 }
 0x628   : > { %1193 = vadd.xlane.f32.xlu1 %v1192_v11 }
 0x62e   : > { %v1071_v22 = vpop.xlane.xlu0 %1070 }
 0x62f   : > { %1662 = vrcp.f32 %v1071_v22 }
 0x634   : > { %v1256_v13 = vpop.permute.xlu1 %1255 }
 0x635   : > { %v1258_v14 = vsel %vm604_vm1, %v1256_v13, 0.0  ;;  %v1663_v27 = vpop.eup %1662  ;;  %vm1370_vm1 = vcmask 8192  }
 0x636   : > { %1259 = vadd.xlane.f32.xlu0 %v1258_v14  ;;  %v1094_v16 = vmul.f32 %v1663_v27, %v1093_v25  ;;  %v1371_v62 = vsel %vm1370_vm1, %v1357_v61, 0.0  ;;  %v1420_v8 = vsel %vm1370_vm1, %v1418_v6, 0.0 }
 0x637   : > { %1372 = vadd.xlane.f32.xlu1 %v1371_v62 }
 0x639   : > { %v1088_v17 = vpop.f32.mrf.mxu1 }
 0x63a   : > { %v1095_v30 = vmul.f32 %v1094_v16, %v1088_v17 }
 0x641   : > { %v1090_v18 = vpop.f32.mrf.mxu1 }
 0x657   : > { %v1146_v19 = vpop.f32.mrf.mxu3 }
 0x65f   : > { %v1148_v20 = vpop.f32.mrf.mxu3 }
 0x668   : > { %v1132_v23 = vpop.xlane.xlu2 %1131 }
 0x669   : > { %1664 = vrcp.f32 %v1132_v23 }
 0x66f   : > { %v1665_v28 = vpop.eup %1664 }
 0x670   : > { %v1152_v29 = vmul.f32 %v1665_v28, %v1151_v26 }
 0x672   : > { %v1153_v31 = vmul.f32 %v1152_v29, %v1146_v19 }
 0x674   : > { %v1154_v32 = vadd.f32 %v1153_v31, %v1095_v30 }
 0x676   : > { %v1289_v47 = vadd.f32 %v1635_v43, %v1154_v32 }
 0x678   : > { %v1291_v50 = vmax.f32 %v1289_v47, 0.0 }
 0x696   : > { %v1214_v33 = vpop.f32.mrf.mxu0 }
 0x69b   : > { %v1194_v36 = vpop.xlane.xlu1 %1193 }
 0x69c   : > { %1666 = vrcp.f32 %v1194_v36 }
 0x69e   : > { %v1216_v35 = vpop.f32.mrf.mxu0 }
 0x6a2   : > { %v1277_v15 = vpop.f32.mrf.mxu2  ;;  %v1667_v39 = vpop.eup %1666 }
 0x6a3   : > { %v1219_v40 = vmul.f32 %v1667_v39, %v1093_v25 }
 0x6a5   : > { %v1220_v45 = vmul.f32 %v1219_v40, %v1214_v33 }
 0x6a9   : > { %v1260_v37 = vpop.xlane.xlu0 %1259 }
 0x6aa   : > { %1668 = vrcp.f32 %v1260_v37  ;;  %v1279_v38 = vpop.f32.mrf.mxu2  ;;  %v1373_v18 = vpop.xlane.xlu1 %1372 }
 0x6ab   : > { %v1374_v19 = vrot.slane %v1373_v18, 4 }
 0x6ad   : > { %v1375_v20 = vadd.f32 %v1374_v19, %v1373_v18 }
 0x6af   : > { %v1376_v22 = vrot.slane %v1375_v20, 2 }
 0x6b0   : > { %v1669_v42 = vpop.eup %1668 }
 0x6b1   : > { %v1282_v44 = vmul.f32 %v1669_v42, %v1151_v26  ;;  %v1377_v23 = vadd.f32 %v1376_v22, %v1375_v20 }
 0x6b3   : > { %v1283_v46 = vmul.f32 %v1282_v44, %v1277_v15  ;;  %v1378_v24 = vrot.slane %v1377_v23, 1 }
 0x6b5   : > { %v1284_v48 = vadd.f32 %v1283_v46, %v1220_v45  ;;  %v1379_v25 = vadd.f32 %v1378_v24, %v1377_v23 }
 0x6b7   : > { %v1290_v49 = vadd.f32 %v1635_v43, %v1284_v48 }
 0x6b9   : > { %v1292_v51 = vmax.f32 %v1290_v49, 0.0 }
 0x6bb   : > { %v1293_v52 = vpack.c.bf16 %v1292_v51, %v1291_v50 }
 0x6bd   : > { %1566 = vmatmul.msk.bf16.vlgmr.msrb.gmra.mxu1 %vm628_vm2, %v1293_v52 }
 0x73a   : > { %v1318_v54 = vpop.f32.mrf.mxu1 }
 0x73b   : > { %v1319_v56 = vadd.f32 %v1636_v55, %v1318_v54 }
 0x73d   : > { %v1323_v59 = vmax.f32 %v1319_v56, 0.0 }
 0x742   : > { %v1320_v57 = vpop.f32.mrf.mxu1 }
 0x743   : > { %v1321_v58 = vadd.f32 %v1636_v55, %v1320_v57 }
 0x745   : > { %v1324_v60 = vmax.f32 %v1321_v58, 0.0 }
 0x747   : > { %v1325_v41 = vpack.c.bf16 %v1324_v60, %v1323_v59 }
 0x749   : > { %1571 = vmatmul.msk.bf16.vlgmr.msrb.gmra.mxu3 %vm628_vm2, %v1325_v41 }
 0x7cc   : > { %v1350_v0 = vpop.f32.mrf.mxu3 }
 0x7cd   : > { %v1967_v1 = vadd.f32 %v1637_v63, %v1350_v0 }
 0x7cf   : > { %v1355_v7 = vmax.f32 %v1967_v1, 0.0 }
 0x7d1   : > { %v1360_v2 = vsel %vm1359_vm9, %v1355_v7, 0.0 }
 0x7d2   : > { %1361 = vadd.xlane.f32.xlu2 %v1360_v2 }
 0x7d4   : > { %v1352_v12 = vpop.f32.mrf.mxu3 }
 0x7d5   : > { %v1973_v3 = vadd.f32 %v1637_v63, %v1352_v12 }
 0x7d7   : > { %v1356_v4 = vmax.f32 %v1973_v3, 0.0 }
 0x7d9   : > { %v1407_v5 = vsel %vm1359_vm9, %v1356_v4, 0.0 }
 0x7da   : > { %1408 = vadd.xlane.f32.xlu0 %v1407_v5  ;;  %1421 = vadd.xlane.f32.xlu2 %v1420_v8 }
 0x845   : > { %v1362_v9 = vpop.xlane.xlu2 %1361 }
 0x846   : > { %v1363_v10 = vrot.slane %v1362_v9, 4 }
 0x848   : > { %v1364_v21 = vadd.f32 %v1363_v10, %v1362_v9 }
 0x84a   : > { %v1365_v11 = vrot.slane %v1364_v21, 2 }
 0x84c   : > { %v1366_v13 = vadd.f32 %v1365_v11, %v1364_v21 }
 0x84d   : > { %v1409_v26 = vpop.xlane.xlu0 %1408  ;;  %v1422_v43 = vpop.xlane.xlu2 %1421 }
 0x84e   : > { %v1367_v14 = vrot.slane %v1366_v13, 1  ;;  %v1410_v27 = vrot.slane %v1409_v26, 4  ;;  %v1423_v44 = vrot.slane %v1422_v43, 4 }
 0x850   : > { %v1368_v17 = vadd.f32 %v1367_v14, %v1366_v13  ;;  %v1411_v16 = vadd.f32 %v1410_v27, %v1409_v26  ;;  %v1424_v45 = vadd.f32 %v1423_v44, %v1422_v43 }
 0x852   : > { %1597 = vpush %v1368_v17  ;;  %v1412_v29 = vrot.slane %v1411_v16, 2  ;;  %v1425_v46 = vrot.slane %v1424_v45, 2 }
 0x853   : > { %1599 = vpush %v1379_v25 }
 0x854   : > { %v1413_v32 = vadd.f32 %v1412_v29, %v1411_v16  ;;  %v1426_v47 = vadd.f32 %v1425_v46, %v1424_v45 }
 0x856   : > { %v1414_v36 = vrot.slane %v1413_v32, 1  ;;  %v1427_v48 = vrot.slane %v1426_v47, 1 }
 0x858   : > { %v1415_v42 = vadd.f32 %v1414_v36, %v1413_v32  ;;  %v1428_v49 = vadd.f32 %v1427_v48, %v1426_v47 }
 0x883   : > { %s1598_s23 = spop %1597 }
 0x884   : > { %s1383_s24 = sadd.f32 1e-05, %s1598_s23  ;;  %s1600_s27 = spop %1599 }
 0x885   : > { %s1381_s28 = ssub.f32 %s1980_s25, %s1600_s27  ;;  %s593_s27 = scalar_lea.vmem %s2020_s18, %s1575_s22 }
 0x886   : > { %v1384_v28 = vstv %s1383_s24 }
 0x887   : > { %1670 = vrcp.f32 %v1384_v28  ;;  %v1396_v34 = vand.u32 2147483648, %v1384_v28  ;;  %v1394_v15 = vand.u32 2147483647, %v1384_v28  ;;  %vm1390_vm10 = vweird.f32 %v1384_v28  ;;  %s1382_s19 = smax.f32 %s1686_s29, %s1381_s28 }
 0x889   : > { %v1397_v38 = vor.u32 1.1754944e-38, %v1396_v34  ;;  %vm1395_vm12 = vcmp.eq.f32.partialorder %v1394_v15, 8.507059e+37 }
 0x88d   : > { %v1671_v30 = vpop.eup %1670 }
 0x88e   : > { %v1386_v31 = vmul.f32 %v1671_v30, %v1384_v28  ;;  %vm1391_vm2 = vweird.f32 %v1671_v30 }
 0x88f   : > { %vm1392_vm11 = vmor %vm1390_vm10, %vm1391_vm2 }
 0x890   : > { %v1387_v33 = vsub.f32 1.0, %v1386_v31 }
 0x892   : > { %v1388_v35 = vmul.f32 %v1671_v30, %v1387_v33 }
 0x894   : > { %v1389_v37 = vadd.f32 %v1671_v30, %v1388_v35 }
 0x896   : > { %v1393_v39 = vsel %vm1392_vm11, %v1671_v30, %v1389_v37 }
 0x897   : > { %v1398_v40 = vsel %vm1395_vm12, %v1397_v38, %v1393_v39 }
 0x898   : > { %1601 = vpush %v1398_v40 }
 0x899   : > { %1603 = vpush %v1415_v42 }
 0x89a   : > { %1605 = vpush %v1428_v49 }
 0x8c9   : > { %s1602_s1 = spop %1601 }
 0x8ca   : > { %s1400_s26 = smul.f32 %s1602_s1, %s1382_s19  ;;  %s1604_s20 = spop %1603 }
 0x8cb   : > { %s1432_s21 = sadd.f32 1e-05, %s1604_s20  ;;  %s1606_s3 = spop %1605 }
 0x8cc   : > { %s1401_s23 = smin.f32 %s1687_s2, %s1400_s26  ;;  %s1430_s0 = ssub.f32 %s1980_s25, %s1606_s3 }
 0x8cd   : > { %v1402_v50 = vstv %s1401_s23  ;;  %v1433_v51 = vstv %s1432_s21 }
 0x8ce   : > { %v1403_v52 = vmul.f32 %v1402_v50, %v1355_v7  ;;  %1672 = vrcp.f32 %v1433_v51  ;;  %v1445_v57 = vand.u32 2147483648, %v1433_v51  ;;  %v1443_v59 = vand.u32 2147483647, %v1433_v51  ;;  %s1431_s22 = smax.f32 %s1686_s29, %s1430_s0 }
 0x8cf   : > { %vm1439_vm15 = vweird.f32 %v1433_v51 }
 0x8d0   : > { %vm1404_vm13 = vcmp.gt.f32.partialorder %v1403_v52, 0.001  ;;  %v1446_v41 = vor.u32 1.1754944e-38, %v1445_v57  ;;  %vm1444_vm3 = vcmp.eq.f32.partialorder %v1443_v59, 8.507059e+37 }
 0x8d1   : > { %v1405_v53 = vsel %vm1404_vm13, %v1403_v52, 0.0 }
 0x8d2   : > { %1406 = vst.msk [vmem:[%s593_s27] sm:$0x7] %vm1359_vm9, %v1405_v53 }
 0x8d4   : > { %v1673_v54 = vpop.eup %1672 }
 0x8d5   : > { %v1435_v55 = vmul.f32 %v1673_v54, %v1433_v51  ;;  %vm1440_vm14 = vweird.f32 %v1673_v54 }
 0x8d6   : > { %vm1441_vm0 = vmor %vm1439_vm15, %vm1440_vm14 }
 0x8d7   : > { %v1436_v56 = vsub.f32 1.0, %v1435_v55 }
 0x8d9   : > { %v1437_v58 = vmul.f32 %v1673_v54, %v1436_v56 }
 0x8db   : > { %v1438_v60 = vadd.f32 %v1673_v54, %v1437_v58 }
 0x8dd   : > { %v1442_v61 = vsel %vm1441_vm0, %v1673_v54, %v1438_v60 }
 0x8de   : > { %v1447_v62 = vsel %vm1444_vm3, %v1446_v41, %v1442_v61 }
 0x8df   : > { %1607 = vpush %v1447_v62 }
 0x910   : > { %s1608_s28 = spop %1607 }
 0x911   : > { %s1449_s19 = smul.f32 %s1608_s28, %s1431_s22 }
 0x913   : > { %s1450_s1 = smin.f32 %s1687_s2, %s1449_s19 }
 0x914   : > { %v1451_v63 = vstv %s1450_s1 }
 0x915   : > { %v1452_v0 = vmul.f32 %v1451_v63, %v1356_v4 }
 0x917   : > { %vm1453_vm4 = vcmp.gt.f32.partialorder %v1452_v0, 0.001 }
 0x918   : > { %v1454_v1 = vsel %vm1453_vm4, %v1452_v0, 0.0 }
 0x919   : > { %1572 = vst.msk [vmem:[%s593_s27 + $0x4] sm:$0x7] %vm1359_vm9, %v1454_v1 }
 0x91a PF: > { %s29_s30 = sadd.s32 1, %s1680_s30  }
 0x91b   : > { %p26_p4 = scmp.ge.s32.totalorder %s29_s30, 4  }
 0x91d   :  { %28 = sbr.rel (!%p26_p4) target bundleno = 12 (0xc), region = 126 }

</bundles_post_ra>
